<compile_context>
chip_gen: v7x
topology: tpu7x:2x2x1
jax: 0.10.0
libtpu: 0.0.40
codegen_flags: <defaults>
</compile_context>

<pallas_src>
import jax
import jax.numpy as jnp
from jax import lax
from jax.experimental import pallas as pl
from jax.experimental.pallas import tpu as pltpu

LEAKY_SLOPE = 0.2
BN_EPS = 1e-5
LANE = 128


# ---------------------------------------------------------------------------
# Fused kernel: projection -> GRU layer 0 -> GRU layer 1 -> output head.
# Weights are pre-transposed (in_features, out_features); gate weights concatenated
# [r|z|n] along the output axis; BN pre-folded into Linear; r/z hidden biases
# pre-folded into the input-side gate bias; b_hn kept as a zero-padded (1,3H) vector.
# ---------------------------------------------------------------------------
def fused_generator_kernel(z_ref, pw_ref, pb_ref,
                           wi0_ref, wh0_ref, gb0_ref, bn0_ref,
                           wi1_ref, wh1_ref, gb1_ref, bn1_ref,
                           w1_ref, b1_ref, w2_ref, b2_ref,
                           o_ref):
    B = z_ref.shape[0]
    H = wh0_ref.shape[0]
    _, T, DPAD = o_ref.shape

    def leaky(x):
        return jnp.where(x > 0, x, LEAKY_SLOPE * x)

    # hoist weight/bias loads once
    wh0 = wh0_ref[...]
    bn0 = bn0_ref[...]
    wh1 = wh1_ref[...]
    bn1 = bn1_ref[...]

    def gru_step(h_t, gconst, wh, bhn_pad):
        # gconst = x@W_i + b_i + [b_hr|b_hz|0]  (loop-invariant parts pre-added)
        ghb = jnp.dot(h_t, wh, preferred_element_type=jnp.float32) + bhn_pad   # (B,3H)
        s = gconst + ghb                                    # ONE full-width add, then slice
        r = jax.nn.sigmoid(s[:, 0:H])
        zg = jax.nn.sigmoid(s[:, H:2 * H])
        n = jnp.tanh(gconst[:, 2 * H:3 * H] + r * ghb[:, 2 * H:3 * H])
        return n + zg * (h_t - n)                           # == (1-z)*n + z*h

    # --- noise projection: Linear (BN folded) + LeakyReLU; Dropout(0.3) eval = identity
    h = leaky(jnp.dot(z_ref[...], pw_ref[...], preferred_element_type=jnp.float32)
              + pb_ref[...])                                                    # (B, H)

    # --- GRU layer 0: x_t == h for every t -> input-side gates are loop-invariant
    gc0 = jnp.dot(h, wi0_ref[...], preferred_element_type=jnp.float32) + gb0_ref[...]
    h_t = jnp.zeros((B, H), jnp.float32)
    h0_seq = []
    for _ in range(T):                       # fully unrolled, T static & small
        h_t = gru_step(h_t, gc0, wh0, bn0)
        h0_seq.append(h_t)                   # stays in vregs, no scratch store

    # --- GRU layer 1: input-side projection for ALL timesteps hoisted out of the loop
    x1 = jnp.concatenate(h0_seq, axis=0)                                        # (T*B, H)
    gc1 = (jnp.dot(x1, wi1_ref[...], preferred_element_type=jnp.float32)
           + gb1_ref[...]).reshape(T, B, 3 * H)
    h_t = jnp.zeros((B, H), jnp.float32)
    h1_seq = []
    for t in range(T):
        h_t = gru_step(h_t, gc1[t], wh1, bn1)
        h1_seq.append(h_t)

    # --- output head (Linear+BN folded -> LeakyReLU -> Linear(padded to 128) -> Tanh)
    y = jnp.concatenate(h1_seq, axis=0)                                         # (T*B, H)
    a = leaky(jnp.dot(y, w1_ref[...], preferred_element_type=jnp.float32) + b1_ref[...])
    out = jnp.tanh(jnp.dot(a, w2_ref[...], preferred_element_type=jnp.float32) + b2_ref[...])
    out = out.reshape(T, B, DPAD)
    # one XLU transpose to batch-major, then a single lane-dense block store
    o_ref[...] = pltpu.einshape("tbd->btd", out)


def improved_generator_forward(z, fused, seq_len, hidden_dim, output_dim):
    B = z.shape[0]
    dpad = fused['out_w2'].shape[1]
    args = (z, fused['proj_w'], fused['proj_b'],
            fused['gru0_wi'], fused['gru0_wh'], fused['gru0_gb'], fused['gru0_bn'],
            fused['gru1_wi'], fused['gru1_wh'], fused['gru1_gb'], fused['gru1_bn'],
            fused['out_w1'], fused['out_b1'], fused['out_w2'], fused['out_b2'])
    # Gridless call: every operand is a full-array VMEM block (no grid -> no double buffers).
    out = pl.pallas_call(
        fused_generator_kernel,
        out_shape=jax.ShapeDtypeStruct((B, seq_len, dpad), jnp.float32),
    )(*args)
    # drop the lane padding in the wrapper (kernel writes a dense 128-lane slab)
    return out[:, :, :output_dim]


# ---------------------------------------------------------------------------
# Parameter init (deterministic, PyTorch-style uniform bounds) + fusion.
# ---------------------------------------------------------------------------
def init_params(key, latent_dim, output_dim, hidden_dim):
    half = hidden_dim // 2
    ks = iter(jax.random.split(key, 64))

    def unif(shape, fan_in):
        bound = 1.0 / float(fan_in) ** 0.5
        return jax.random.uniform(next(ks), shape, jnp.float32, -bound, bound)

    p = {}
    # noise_projection Linear(latent -> hidden)
    p['proj_w'] = unif((latent_dim, hidden_dim), latent_dim)
    p['proj_b'] = unif((1, hidden_dim), latent_dim)
    # BatchNorm1d(hidden) eval: gamma=1, beta=0, running_mean=0, running_var=1
    p['proj_scale'] = jnp.full((1, hidden_dim), 1.0 / (1.0 + BN_EPS) ** 0.5, jnp.float32)
    p['proj_shift'] = jnp.zeros((1, hidden_dim), jnp.float32)

    # 2-layer GRU (input size == hidden for both layers); weights pre-transposed (H_in, H)
    gru = []
    for _layer in range(2):
        lp = {}
        for name in ('wir', 'wiz', 'win', 'whr', 'whz', 'whn'):
            lp[name] = unif((hidden_dim, hidden_dim), hidden_dim)
        for name in ('bir', 'biz', 'bin', 'bhr', 'bhz', 'bhn'):
            lp[name] = unif((1, hidden_dim), hidden_dim)
        gru.append(lp)
    p['gru'] = gru

    # output head
    p['out_w1'] = unif((hidden_dim, half), hidden_dim)
    p['out_b1'] = unif((1, half), hidden_dim)
    p['out_scale'] = jnp.full((1, half), 1.0 / (1.0 + BN_EPS) ** 0.5, jnp.float32)
    p['out_shift'] = jnp.zeros((1, half), jnp.float32)
    p['out_w2'] = unif((half, output_dim), half)
    p['out_b2'] = unif((1, output_dim), half)
    return p


def fuse_params(p, output_dim):
    """Fold eval-mode BN into Linear, concat GRU gates, pre-fold r/z hidden biases,
    lane-pad the final Linear to 128."""
    f = {}
    # scale*(xW + b) + shift == x(W*scale) + (b*scale + shift)   (exact fold at init)
    f['proj_w'] = p['proj_w'] * p['proj_scale']
    f['proj_b'] = p['proj_b'] * p['proj_scale'] + p['proj_shift']
    for l, lp in enumerate(p['gru']):
        zeros = jnp.zeros_like(lp['bhn'])
        f[f'gru{l}_wi'] = jnp.concatenate([lp['wir'], lp['wiz'], lp['win']], axis=1)  # (H, 3H)
        f[f'gru{l}_wh'] = jnp.concatenate([lp['whr'], lp['whz'], lp['whn']], axis=1)  # (H, 3H)
        # input-side gate bias with the loop-invariant r/z hidden biases pre-added
        f[f'gru{l}_gb'] = jnp.concatenate([lp['bir'] + lp['bhr'],
                                           lp['biz'] + lp['bhz'],
                                           lp['bin']], axis=1)                        # (1, 3H)
        # hidden-side n bias, zero-padded so it can be added to the full (B,3H) gh
        f[f'gru{l}_bn'] = jnp.concatenate([zeros, zeros, lp['bhn']], axis=1)          # (1, 3H)
    f['out_w1'] = p['out_w1'] * p['out_scale']
    f['out_b1'] = p['out_b1'] * p['out_scale'] + p['out_shift']
    half = p['out_w1'].shape[1]
    dpad = ((output_dim + LANE - 1) // LANE) * LANE
    f['out_w2'] = jnp.zeros((half, dpad), jnp.float32).at[:, :output_dim].set(p['out_w2'])
    f['out_b2'] = jnp.zeros((1, dpad), jnp.float32).at[:, :output_dim].set(p['out_b2'])
    return f


# ---------------------------------------------------------------------------
# Pure-JAX reference (unfused, PyTorch-equation form) for a correctness check.
# ---------------------------------------------------------------------------
def reference_forward(z, p, seq_len):
    h = z @ p['proj_w'] + p['proj_b']
    h = h * p['proj_scale'] + p['proj_shift']
    h = jnp.where(h > 0, h, LEAKY_SLOPE * h)
    x = jnp.broadcast_to(h[None], (seq_len, *h.shape))
    for lp in p['gru']:
        def step(h_prev, x_t, lp=lp):
            r = jax.nn.sigmoid(x_t @ lp['wir'] + lp['bir'] + h_prev @ lp['whr'] + lp['bhr'])
            zg = jax.nn.sigmoid(x_t @ lp['wiz'] + lp['biz'] + h_prev @ lp['whz'] + lp['bhz'])
            n = jnp.tanh(x_t @ lp['win'] + lp['bin']
                         + r * (h_prev @ lp['whn'] + lp['bhn']))
            h_new = (1.0 - zg) * n + zg * h_prev
            return h_new, h_new
        h0 = jnp.zeros((z.shape[0], lp['whr'].shape[0]), jnp.float32)
        _, x = lax.scan(step, h0, x)
    flat = jnp.transpose(x, (1, 0, 2)).reshape(-1, x.shape[-1])
    y = flat @ p['out_w1'] + p['out_b1']
    y = y * p['out_scale'] + p['out_shift']
    y = jnp.where(y > 0, y, LEAKY_SLOPE * y)
    y = jnp.tanh(y @ p['out_w2'] + p['out_b2'])
    return y.reshape(z.shape[0], seq_len, -1)


if __name__ == "__main__":
    batch, latent_dim, hidden_dim, seq_len, output_dim = 8, 16, 32, 8, 4

    key = jax.random.PRNGKey(0)
    k_param, k_z = jax.random.split(key)
    params = init_params(k_param, latent_dim, output_dim, hidden_dim)
    fused = fuse_params(params, output_dim)
    z = jax.random.normal(k_z, (batch, latent_dim), dtype=jnp.float32)

    fwd = jax.jit(lambda zz: improved_generator_forward(
        zz, fused, seq_len, hidden_dim, output_dim))
    out = fwd(z)
    jax.block_until_ready(out)

    ref = reference_forward(z, params, seq_len)
    assert out.shape == (batch, seq_len, output_dim)
    assert jnp.allclose(out, ref, atol=1e-4, rtol=1e-4), "mismatch vs JAX reference"

    # TODO(synk): training-mode BatchNorm (batch statistics) and Dropout masks are not
    # implemented; eval-mode semantics are used, matching model.eval() inference.
    print("KERNEL_OK")
</pallas_src>

<mosaic_0001>
module attributes {stable_mosaic.version = 11 : i64} {
  func.func @fused_generator_kernel(%arg0: memref<8x16xf32, #tpu.memory_space<vmem>>, %arg1: memref<16x32xf32, #tpu.memory_space<vmem>>, %arg2: memref<1x32xf32, #tpu.memory_space<vmem>>, %arg3: memref<32x96xf32, #tpu.memory_space<vmem>>, %arg4: memref<32x96xf32, #tpu.memory_space<vmem>>, %arg5: memref<1x96xf32, #tpu.memory_space<vmem>>, %arg6: memref<1x96xf32, #tpu.memory_space<vmem>>, %arg7: memref<32x96xf32, #tpu.memory_space<vmem>>, %arg8: memref<32x96xf32, #tpu.memory_space<vmem>>, %arg9: memref<1x96xf32, #tpu.memory_space<vmem>>, %arg10: memref<1x96xf32, #tpu.memory_space<vmem>>, %arg11: memref<32x16xf32, #tpu.memory_space<vmem>>, %arg12: memref<1x16xf32, #tpu.memory_space<vmem>>, %arg13: memref<16x128xf32, #tpu.memory_space<vmem>>, %arg14: memref<1x128xf32, #tpu.memory_space<vmem>>, %arg15: memref<8x8x128xf32, #tpu.memory_space<vmem>>) attributes {dimension_semantics = [], scalar_prefetch = 0 : i64, scratch_operands = 0 : i64, tpu.core_type = #tpu.core_type<tc>} {
    %c0 = arith.constant 0 : index
    %c0_0 = arith.constant 0 : index
    %0 = vector.load %arg4[%c0, %c0_0] : memref<32x96xf32, #tpu.memory_space<vmem>>, vector<32x96xf32>
    %c0_1 = arith.constant 0 : index
    %c0_2 = arith.constant 0 : index
    %1 = vector.load %arg6[%c0_1, %c0_2] : memref<1x96xf32, #tpu.memory_space<vmem>>, vector<1x96xf32>
    %c0_3 = arith.constant 0 : index
    %c0_4 = arith.constant 0 : index
    %2 = vector.load %arg8[%c0_3, %c0_4] : memref<32x96xf32, #tpu.memory_space<vmem>>, vector<32x96xf32>
    %c0_5 = arith.constant 0 : index
    %c0_6 = arith.constant 0 : index
    %3 = vector.load %arg10[%c0_5, %c0_6] : memref<1x96xf32, #tpu.memory_space<vmem>>, vector<1x96xf32>
    %c0_7 = arith.constant 0 : index
    %c0_8 = arith.constant 0 : index
    %4 = vector.load %arg0[%c0_7, %c0_8] : memref<8x16xf32, #tpu.memory_space<vmem>>, vector<8x16xf32>
    %c0_9 = arith.constant 0 : index
    %c0_10 = arith.constant 0 : index
    %5 = vector.load %arg1[%c0_9, %c0_10] : memref<16x32xf32, #tpu.memory_space<vmem>>, vector<16x32xf32>
    %cst = arith.constant dense<0.000000e+00> : vector<8x32xf32>
    %6 = tpu.matmul %4, %5, %cst {dimension_numbers = #tpu.dot_dimension_numbers<[1], [0], [0], [1], [0, 0, 1, 1], [], []>} : vector<8x16xf32>, vector<16x32xf32>, vector<8x32xf32> -> vector<8x32xf32>
    %c0_11 = arith.constant 0 : index
    %c0_12 = arith.constant 0 : index
    %7 = vector.load %arg2[%c0_11, %c0_12] : memref<1x32xf32, #tpu.memory_space<vmem>>, vector<1x32xf32>
    %8 = vector.broadcast %7 : vector<1x32xf32> to vector<8x32xf32>
    %9 = arith.addf %6, %8 : vector<8x32xf32>
    %cst_13 = arith.constant 0.000000e+00 : f32
    %10 = vector.broadcast %cst_13 : f32 to vector<8x32xf32>
    %11 = arith.cmpf ogt, %9, %10 : vector<8x32xf32>
    %cst_14 = arith.constant 2.000000e-01 : f32
    %12 = vector.broadcast %cst_14 : f32 to vector<8x32xf32>
    %13 = arith.mulf %12, %9 : vector<8x32xf32>
    %14 = arith.select %11, %9, %13 : vector<8x32xi1>, vector<8x32xf32>
    %c0_15 = arith.constant 0 : index
    %c0_16 = arith.constant 0 : index
    %15 = vector.load %arg3[%c0_15, %c0_16] : memref<32x96xf32, #tpu.memory_space<vmem>>, vector<32x96xf32>
    %cst_17 = arith.constant dense<0.000000e+00> : vector<8x96xf32>
    %16 = tpu.matmul %14, %15, %cst_17 {dimension_numbers = #tpu.dot_dimension_numbers<[1], [0], [0], [1], [0, 0, 1, 1], [], []>} : vector<8x32xf32>, vector<32x96xf32>, vector<8x96xf32> -> vector<8x96xf32>
    %c0_18 = arith.constant 0 : index
    %c0_19 = arith.constant 0 : index
    %17 = vector.load %arg5[%c0_18, %c0_19] : memref<1x96xf32, #tpu.memory_space<vmem>>, vector<1x96xf32>
    %18 = vector.broadcast %17 : vector<1x96xf32> to vector<8x96xf32>
    %19 = arith.addf %16, %18 : vector<8x96xf32>
    %cst_20 = arith.constant 0.000000e+00 : f32
    %20 = vector.broadcast %cst_20 : f32 to vector<8x32xf32>
    %cst_21 = arith.constant dense<0.000000e+00> : vector<8x96xf32>
    %21 = tpu.matmul %20, %0, %cst_21 {dimension_numbers = #tpu.dot_dimension_numbers<[1], [0], [0], [1], [0, 0, 1, 1], [], []>} : vector<8x32xf32>, vector<32x96xf32>, vector<8x96xf32> -> vector<8x96xf32>
    %22 = vector.broadcast %1 : vector<1x96xf32> to vector<8x96xf32>
    %23 = arith.addf %21, %22 : vector<8x96xf32>
    %24 = arith.addf %19, %23 : vector<8x96xf32>
    %25 = vector.extract_strided_slice %24 {offsets = [0, 0], sizes = [8, 32], strides = [1, 1]} : vector<8x96xf32> to vector<8x32xf32>
    %26 = arith.negf %25 : vector<8x32xf32>
    %27 = math.exp %26 : vector<8x32xf32>
    %cst_22 = arith.constant 1.000000e+00 : f32
    %28 = vector.broadcast %cst_22 : f32 to vector<8x32xf32>
    %29 = arith.addf %28, %27 : vector<8x32xf32>
    %30 = arith.divf %28, %29 : vector<8x32xf32>
    %31 = vector.extract_strided_slice %24 {offsets = [0, 32], sizes = [8, 32], strides = [1, 1]} : vector<8x96xf32> to vector<8x32xf32>
    %32 = arith.negf %31 : vector<8x32xf32>
    %33 = math.exp %32 : vector<8x32xf32>
    %cst_23 = arith.constant 1.000000e+00 : f32
    %34 = vector.broadcast %cst_23 : f32 to vector<8x32xf32>
    %35 = arith.addf %34, %33 : vector<8x32xf32>
    %36 = arith.divf %34, %35 : vector<8x32xf32>
    %37 = vector.extract_strided_slice %19 {offsets = [0, 64], sizes = [8, 32], strides = [1, 1]} : vector<8x96xf32> to vector<8x32xf32>
    %38 = vector.extract_strided_slice %23 {offsets = [0, 64], sizes = [8, 32], strides = [1, 1]} : vector<8x96xf32> to vector<8x32xf32>
    %39 = arith.mulf %30, %38 : vector<8x32xf32>
    %40 = arith.addf %37, %39 : vector<8x32xf32>
    %41 = math.tanh %40 : vector<8x32xf32>
    %42 = arith.subf %20, %41 : vector<8x32xf32>
    %43 = arith.mulf %36, %42 : vector<8x32xf32>
    %44 = arith.addf %41, %43 : vector<8x32xf32>
    %cst_24 = arith.constant dense<0.000000e+00> : vector<8x96xf32>
    %45 = tpu.matmul %44, %0, %cst_24 {dimension_numbers = #tpu.dot_dimension_numbers<[1], [0], [0], [1], [0, 0, 1, 1], [], []>} : vector<8x32xf32>, vector<32x96xf32>, vector<8x96xf32> -> vector<8x96xf32>
    %46 = vector.broadcast %1 : vector<1x96xf32> to vector<8x96xf32>
    %47 = arith.addf %45, %46 : vector<8x96xf32>
    %48 = arith.addf %19, %47 : vector<8x96xf32>
    %49 = vector.extract_strided_slice %48 {offsets = [0, 0], sizes = [8, 32], strides = [1, 1]} : vector<8x96xf32> to vector<8x32xf32>
    %50 = arith.negf %49 : vector<8x32xf32>
    %51 = math.exp %50 : vector<8x32xf32>
    %cst_25 = arith.constant 1.000000e+00 : f32
    %52 = vector.broadcast %cst_25 : f32 to vector<8x32xf32>
    %53 = arith.addf %52, %51 : vector<8x32xf32>
    %54 = arith.divf %52, %53 : vector<8x32xf32>
    %55 = vector.extract_strided_slice %48 {offsets = [0, 32], sizes = [8, 32], strides = [1, 1]} : vector<8x96xf32> to vector<8x32xf32>
    %56 = arith.negf %55 : vector<8x32xf32>
    %57 = math.exp %56 : vector<8x32xf32>
    %cst_26 = arith.constant 1.000000e+00 : f32
    %58 = vector.broadcast %cst_26 : f32 to vector<8x32xf32>
    %59 = arith.addf %58, %57 : vector<8x32xf32>
    %60 = arith.divf %58, %59 : vector<8x32xf32>
    %61 = vector.extract_strided_slice %19 {offsets = [0, 64], sizes = [8, 32], strides = [1, 1]} : vector<8x96xf32> to vector<8x32xf32>
    %62 = vector.extract_strided_slice %47 {offsets = [0, 64], sizes = [8, 32], strides = [1, 1]} : vector<8x96xf32> to vector<8x32xf32>
    %63 = arith.mulf %54, %62 : vector<8x32xf32>
    %64 = arith.addf %61, %63 : vector<8x32xf32>
    %65 = math.tanh %64 : vector<8x32xf32>
    %66 = arith.subf %44, %65 : vector<8x32xf32>
    %67 = arith.mulf %60, %66 : vector<8x32xf32>
    %68 = arith.addf %65, %67 : vector<8x32xf32>
    %cst_27 = arith.constant dense<0.000000e+00> : vector<8x96xf32>
    %69 = tpu.matmul %68, %0, %cst_27 {dimension_numbers = #tpu.dot_dimension_numbers<[1], [0], [0], [1], [0, 0, 1, 1], [], []>} : vector<8x32xf32>, vector<32x96xf32>, vector<8x96xf32> -> vector<8x96xf32>
    %70 = vector.broadcast %1 : vector<1x96xf32> to vector<8x96xf32>
    %71 = arith.addf %69, %70 : vector<8x96xf32>
    %72 = arith.addf %19, %71 : vector<8x96xf32>
    %73 = vector.extract_strided_slice %72 {offsets = [0, 0], sizes = [8, 32], strides = [1, 1]} : vector<8x96xf32> to vector<8x32xf32>
    %74 = arith.negf %73 : vector<8x32xf32>
    %75 = math.exp %74 : vector<8x32xf32>
    %cst_28 = arith.constant 1.000000e+00 : f32
    %76 = vector.broadcast %cst_28 : f32 to vector<8x32xf32>
    %77 = arith.addf %76, %75 : vector<8x32xf32>
    %78 = arith.divf %76, %77 : vector<8x32xf32>
    %79 = vector.extract_strided_slice %72 {offsets = [0, 32], sizes = [8, 32], strides = [1, 1]} : vector<8x96xf32> to vector<8x32xf32>
    %80 = arith.negf %79 : vector<8x32xf32>
    %81 = math.exp %80 : vector<8x32xf32>
    %cst_29 = arith.constant 1.000000e+00 : f32
    %82 = vector.broadcast %cst_29 : f32 to vector<8x32xf32>
    %83 = arith.addf %82, %81 : vector<8x32xf32>
    %84 = arith.divf %82, %83 : vector<8x32xf32>
    %85 = vector.extract_strided_slice %19 {offsets = [0, 64], sizes = [8, 32], strides = [1, 1]} : vector<8x96xf32> to vector<8x32xf32>
    %86 = vector.extract_strided_slice %71 {offsets = [0, 64], sizes = [8, 32], strides = [1, 1]} : vector<8x96xf32> to vector<8x32xf32>
    %87 = arith.mulf %78, %86 : vector<8x32xf32>
    %88 = arith.addf %85, %87 : vector<8x32xf32>
    %89 = math.tanh %88 : vector<8x32xf32>
    %90 = arith.subf %68, %89 : vector<8x32xf32>
    %91 = arith.mulf %84, %90 : vector<8x32xf32>
    %92 = arith.addf %89, %91 : vector<8x32xf32>
    %cst_30 = arith.constant dense<0.000000e+00> : vector<8x96xf32>
    %93 = tpu.matmul %92, %0, %cst_30 {dimension_numbers = #tpu.dot_dimension_numbers<[1], [0], [0], [1], [0, 0, 1, 1], [], []>} : vector<8x32xf32>, vector<32x96xf32>, vector<8x96xf32> -> vector<8x96xf32>
    %94 = vector.broadcast %1 : vector<1x96xf32> to vector<8x96xf32>
    %95 = arith.addf %93, %94 : vector<8x96xf32>
    %96 = arith.addf %19, %95 : vector<8x96xf32>
    %97 = vector.extract_strided_slice %96 {offsets = [0, 0], sizes = [8, 32], strides = [1, 1]} : vector<8x96xf32> to vector<8x32xf32>
    %98 = arith.negf %97 : vector<8x32xf32>
    %99 = math.exp %98 : vector<8x32xf32>
    %cst_31 = arith.constant 1.000000e+00 : f32
    %100 = vector.broadcast %cst_31 : f32 to vector<8x32xf32>
    %101 = arith.addf %100, %99 : vector<8x32xf32>
    %102 = arith.divf %100, %101 : vector<8x32xf32>
    %103 = vector.extract_strided_slice %96 {offsets = [0, 32], sizes = [8, 32], strides = [1, 1]} : vector<8x96xf32> to vector<8x32xf32>
    %104 = arith.negf %103 : vector<8x32xf32>
    %105 = math.exp %104 : vector<8x32xf32>
    %cst_32 = arith.constant 1.000000e+00 : f32
    %106 = vector.broadcast %cst_32 : f32 to vector<8x32xf32>
    %107 = arith.addf %106, %105 : vector<8x32xf32>
    %108 = arith.divf %106, %107 : vector<8x32xf32>
    %109 = vector.extract_strided_slice %19 {offsets = [0, 64], sizes = [8, 32], strides = [1, 1]} : vector<8x96xf32> to vector<8x32xf32>
    %110 = vector.extract_strided_slice %95 {offsets = [0, 64], sizes = [8, 32], strides = [1, 1]} : vector<8x96xf32> to vector<8x32xf32>
    %111 = arith.mulf %102, %110 : vector<8x32xf32>
    %112 = arith.addf %109, %111 : vector<8x32xf32>
    %113 = math.tanh %112 : vector<8x32xf32>
    %114 = arith.subf %92, %113 : vector<8x32xf32>
    %115 = arith.mulf %108, %114 : vector<8x32xf32>
    %116 = arith.addf %113, %115 : vector<8x32xf32>
    %cst_33 = arith.constant dense<0.000000e+00> : vector<8x96xf32>
    %117 = tpu.matmul %116, %0, %cst_33 {dimension_numbers = #tpu.dot_dimension_numbers<[1], [0], [0], [1], [0, 0, 1, 1], [], []>} : vector<8x32xf32>, vector<32x96xf32>, vector<8x96xf32> -> vector<8x96xf32>
    %118 = vector.broadcast %1 : vector<1x96xf32> to vector<8x96xf32>
    %119 = arith.addf %117, %118 : vector<8x96xf32>
    %120 = arith.addf %19, %119 : vector<8x96xf32>
    %121 = vector.extract_strided_slice %120 {offsets = [0, 0], sizes = [8, 32], strides = [1, 1]} : vector<8x96xf32> to vector<8x32xf32>
    %122 = arith.negf %121 : vector<8x32xf32>
    %123 = math.exp %122 : vector<8x32xf32>
    %cst_34 = arith.constant 1.000000e+00 : f32
    %124 = vector.broadcast %cst_34 : f32 to vector<8x32xf32>
    %125 = arith.addf %124, %123 : vector<8x32xf32>
    %126 = arith.divf %124, %125 : vector<8x32xf32>
    %127 = vector.extract_strided_slice %120 {offsets = [0, 32], sizes = [8, 32], strides = [1, 1]} : vector<8x96xf32> to vector<8x32xf32>
    %128 = arith.negf %127 : vector<8x32xf32>
    %129 = math.exp %128 : vector<8x32xf32>
    %cst_35 = arith.constant 1.000000e+00 : f32
    %130 = vector.broadcast %cst_35 : f32 to vector<8x32xf32>
    %131 = arith.addf %130, %129 : vector<8x32xf32>
    %132 = arith.divf %130, %131 : vector<8x32xf32>
    %133 = vector.extract_strided_slice %19 {offsets = [0, 64], sizes = [8, 32], strides = [1, 1]} : vector<8x96xf32> to vector<8x32xf32>
    %134 = vector.extract_strided_slice %119 {offsets = [0, 64], sizes = [8, 32], strides = [1, 1]} : vector<8x96xf32> to vector<8x32xf32>
    %135 = arith.mulf %126, %134 : vector<8x32xf32>
    %136 = arith.addf %133, %135 : vector<8x32xf32>
    %137 = math.tanh %136 : vector<8x32xf32>
    %138 = arith.subf %116, %137 : vector<8x32xf32>
    %139 = arith.mulf %132, %138 : vector<8x32xf32>
    %140 = arith.addf %137, %139 : vector<8x32xf32>
    %cst_36 = arith.constant dense<0.000000e+00> : vector<8x96xf32>
    %141 = tpu.matmul %140, %0, %cst_36 {dimension_numbers = #tpu.dot_dimension_numbers<[1], [0], [0], [1], [0, 0, 1, 1], [], []>} : vector<8x32xf32>, vector<32x96xf32>, vector<8x96xf32> -> vector<8x96xf32>
    %142 = vector.broadcast %1 : vector<1x96xf32> to vector<8x96xf32>
    %143 = arith.addf %141, %142 : vector<8x96xf32>
    %144 = arith.addf %19, %143 : vector<8x96xf32>
    %145 = vector.extract_strided_slice %144 {offsets = [0, 0], sizes = [8, 32], strides = [1, 1]} : vector<8x96xf32> to vector<8x32xf32>
    %146 = arith.negf %145 : vector<8x32xf32>
    %147 = math.exp %146 : vector<8x32xf32>
    %cst_37 = arith.constant 1.000000e+00 : f32
    %148 = vector.broadcast %cst_37 : f32 to vector<8x32xf32>
    %149 = arith.addf %148, %147 : vector<8x32xf32>
    %150 = arith.divf %148, %149 : vector<8x32xf32>
    %151 = vector.extract_strided_slice %144 {offsets = [0, 32], sizes = [8, 32], strides = [1, 1]} : vector<8x96xf32> to vector<8x32xf32>
    %152 = arith.negf %151 : vector<8x32xf32>
    %153 = math.exp %152 : vector<8x32xf32>
    %cst_38 = arith.constant 1.000000e+00 : f32
    %154 = vector.broadcast %cst_38 : f32 to vector<8x32xf32>
    %155 = arith.addf %154, %153 : vector<8x32xf32>
    %156 = arith.divf %154, %155 : vector<8x32xf32>
    %157 = vector.extract_strided_slice %19 {offsets = [0, 64], sizes = [8, 32], strides = [1, 1]} : vector<8x96xf32> to vector<8x32xf32>
    %158 = vector.extract_strided_slice %143 {offsets = [0, 64], sizes = [8, 32], strides = [1, 1]} : vector<8x96xf32> to vector<8x32xf32>
    %159 = arith.mulf %150, %158 : vector<8x32xf32>
    %160 = arith.addf %157, %159 : vector<8x32xf32>
    %161 = math.tanh %160 : vector<8x32xf32>
    %162 = arith.subf %140, %161 : vector<8x32xf32>
    %163 = arith.mulf %156, %162 : vector<8x32xf32>
    %164 = arith.addf %161, %163 : vector<8x32xf32>
    %cst_39 = arith.constant dense<0.000000e+00> : vector<8x96xf32>
    %165 = tpu.matmul %164, %0, %cst_39 {dimension_numbers = #tpu.dot_dimension_numbers<[1], [0], [0], [1], [0, 0, 1, 1], [], []>} : vector<8x32xf32>, vector<32x96xf32>, vector<8x96xf32> -> vector<8x96xf32>
    %166 = vector.broadcast %1 : vector<1x96xf32> to vector<8x96xf32>
    %167 = arith.addf %165, %166 : vector<8x96xf32>
    %168 = arith.addf %19, %167 : vector<8x96xf32>
    %169 = vector.extract_strided_slice %168 {offsets = [0, 0], sizes = [8, 32], strides = [1, 1]} : vector<8x96xf32> to vector<8x32xf32>
    %170 = arith.negf %169 : vector<8x32xf32>
    %171 = math.exp %170 : vector<8x32xf32>
    %cst_40 = arith.constant 1.000000e+00 : f32
    %172 = vector.broadcast %cst_40 : f32 to vector<8x32xf32>
    %173 = arith.addf %172, %171 : vector<8x32xf32>
    %174 = arith.divf %172, %173 : vector<8x32xf32>
    %175 = vector.extract_strided_slice %168 {offsets = [0, 32], sizes = [8, 32], strides = [1, 1]} : vector<8x96xf32> to vector<8x32xf32>
    %176 = arith.negf %175 : vector<8x32xf32>
    %177 = math.exp %176 : vector<8x32xf32>
    %cst_41 = arith.constant 1.000000e+00 : f32
    %178 = vector.broadcast %cst_41 : f32 to vector<8x32xf32>
    %179 = arith.addf %178, %177 : vector<8x32xf32>
    %180 = arith.divf %178, %179 : vector<8x32xf32>
    %181 = vector.extract_strided_slice %19 {offsets = [0, 64], sizes = [8, 32], strides = [1, 1]} : vector<8x96xf32> to vector<8x32xf32>
    %182 = vector.extract_strided_slice %167 {offsets = [0, 64], sizes = [8, 32], strides = [1, 1]} : vector<8x96xf32> to vector<8x32xf32>
    %183 = arith.mulf %174, %182 : vector<8x32xf32>
    %184 = arith.addf %181, %183 : vector<8x32xf32>
    %185 = math.tanh %184 : vector<8x32xf32>
    %186 = arith.subf %164, %185 : vector<8x32xf32>
    %187 = arith.mulf %180, %186 : vector<8x32xf32>
    %188 = arith.addf %185, %187 : vector<8x32xf32>
    %cst_42 = arith.constant dense<0.000000e+00> : vector<8x96xf32>
    %189 = tpu.matmul %188, %0, %cst_42 {dimension_numbers = #tpu.dot_dimension_numbers<[1], [0], [0], [1], [0, 0, 1, 1], [], []>} : vector<8x32xf32>, vector<32x96xf32>, vector<8x96xf32> -> vector<8x96xf32>
    %190 = vector.broadcast %1 : vector<1x96xf32> to vector<8x96xf32>
    %191 = arith.addf %189, %190 : vector<8x96xf32>
    %192 = arith.addf %19, %191 : vector<8x96xf32>
    %193 = vector.extract_strided_slice %192 {offsets = [0, 0], sizes = [8, 32], strides = [1, 1]} : vector<8x96xf32> to vector<8x32xf32>
    %194 = arith.negf %193 : vector<8x32xf32>
    %195 = math.exp %194 : vector<8x32xf32>
    %cst_43 = arith.constant 1.000000e+00 : f32
    %196 = vector.broadcast %cst_43 : f32 to vector<8x32xf32>
    %197 = arith.addf %196, %195 : vector<8x32xf32>
    %198 = arith.divf %196, %197 : vector<8x32xf32>
    %199 = vector.extract_strided_slice %192 {offsets = [0, 32], sizes = [8, 32], strides = [1, 1]} : vector<8x96xf32> to vector<8x32xf32>
    %200 = arith.negf %199 : vector<8x32xf32>
    %201 = math.exp %200 : vector<8x32xf32>
    %cst_44 = arith.constant 1.000000e+00 : f32
    %202 = vector.broadcast %cst_44 : f32 to vector<8x32xf32>
    %203 = arith.addf %202, %201 : vector<8x32xf32>
    %204 = arith.divf %202, %203 : vector<8x32xf32>
    %205 = vector.extract_strided_slice %19 {offsets = [0, 64], sizes = [8, 32], strides = [1, 1]} : vector<8x96xf32> to vector<8x32xf32>
    %206 = vector.extract_strided_slice %191 {offsets = [0, 64], sizes = [8, 32], strides = [1, 1]} : vector<8x96xf32> to vector<8x32xf32>
    %207 = arith.mulf %198, %206 : vector<8x32xf32>
    %208 = arith.addf %205, %207 : vector<8x32xf32>
    %209 = math.tanh %208 : vector<8x32xf32>
    %210 = arith.subf %188, %209 : vector<8x32xf32>
    %211 = arith.mulf %204, %210 : vector<8x32xf32>
    %212 = arith.addf %209, %211 : vector<8x32xf32>
    %213 = tpu.concatenate %44, %68, %92, %116, %140, %164, %188, %212 in 0 : vector<8x32xf32>, vector<8x32xf32>, vector<8x32xf32>, vector<8x32xf32>, vector<8x32xf32>, vector<8x32xf32>, vector<8x32xf32>, vector<8x32xf32> -> vector<64x32xf32>
    %c0_45 = arith.constant 0 : index
    %c0_46 = arith.constant 0 : index
    %214 = vector.load %arg7[%c0_45, %c0_46] : memref<32x96xf32, #tpu.memory_space<vmem>>, vector<32x96xf32>
    %cst_47 = arith.constant dense<0.000000e+00> : vector<64x96xf32>
    %215 = tpu.matmul %213, %214, %cst_47 {dimension_numbers = #tpu.dot_dimension_numbers<[1], [0], [0], [1], [0, 0, 1, 1], [], []>} : vector<64x32xf32>, vector<32x96xf32>, vector<64x96xf32> -> vector<64x96xf32>
    %c0_48 = arith.constant 0 : index
    %c0_49 = arith.constant 0 : index
    %216 = vector.load %arg9[%c0_48, %c0_49] : memref<1x96xf32, #tpu.memory_space<vmem>>, vector<1x96xf32>
    %217 = vector.broadcast %216 : vector<1x96xf32> to vector<64x96xf32>
    %218 = arith.addf %215, %217 : vector<64x96xf32>
    %219 = vector.shape_cast %218 : vector<64x96xf32> to vector<8x8x96xf32>
    %cst_50 = arith.constant 0.000000e+00 : f32
    %220 = vector.broadcast %cst_50 : f32 to vector<8x32xf32>
    %221 = vector.extract_strided_slice %219 {offsets = [0, 0, 0], sizes = [1, 8, 96], strides = [1, 1, 1]} : vector<8x8x96xf32> to vector<1x8x96xf32>
    %222 = vector.shape_cast %221 : vector<1x8x96xf32> to vector<8x96xf32>
    %cst_51 = arith.constant dense<0.000000e+00> : vector<8x96xf32>
    %223 = tpu.matmul %220, %2, %cst_51 {dimension_numbers = #tpu.dot_dimension_numbers<[1], [0], [0], [1], [0, 0, 1, 1], [], []>} : vector<8x32xf32>, vector<32x96xf32>, vector<8x96xf32> -> vector<8x96xf32>
    %224 = vector.broadcast %3 : vector<1x96xf32> to vector<8x96xf32>
    %225 = arith.addf %223, %224 : vector<8x96xf32>
    %226 = arith.addf %222, %225 : vector<8x96xf32>
    %227 = vector.extract_strided_slice %226 {offsets = [0, 0], sizes = [8, 32], strides = [1, 1]} : vector<8x96xf32> to vector<8x32xf32>
    %228 = arith.negf %227 : vector<8x32xf32>
    %229 = math.exp %228 : vector<8x32xf32>
    %cst_52 = arith.constant 1.000000e+00 : f32
    %230 = vector.broadcast %cst_52 : f32 to vector<8x32xf32>
    %231 = arith.addf %230, %229 : vector<8x32xf32>
    %232 = arith.divf %230, %231 : vector<8x32xf32>
    %233 = vector.extract_strided_slice %226 {offsets = [0, 32], sizes = [8, 32], strides = [1, 1]} : vector<8x96xf32> to vector<8x32xf32>
    %234 = arith.negf %233 : vector<8x32xf32>
    %235 = math.exp %234 : vector<8x32xf32>
    %cst_53 = arith.constant 1.000000e+00 : f32
    %236 = vector.broadcast %cst_53 : f32 to vector<8x32xf32>
    %237 = arith.addf %236, %235 : vector<8x32xf32>
    %238 = arith.divf %236, %237 : vector<8x32xf32>
    %239 = vector.extract_strided_slice %222 {offsets = [0, 64], sizes = [8, 32], strides = [1, 1]} : vector<8x96xf32> to vector<8x32xf32>
    %240 = vector.extract_strided_slice %225 {offsets = [0, 64], sizes = [8, 32], strides = [1, 1]} : vector<8x96xf32> to vector<8x32xf32>
    %241 = arith.mulf %232, %240 : vector<8x32xf32>
    %242 = arith.addf %239, %241 : vector<8x32xf32>
    %243 = math.tanh %242 : vector<8x32xf32>
    %244 = arith.subf %220, %243 : vector<8x32xf32>
    %245 = arith.mulf %238, %244 : vector<8x32xf32>
    %246 = arith.addf %243, %245 : vector<8x32xf32>
    %247 = vector.extract_strided_slice %219 {offsets = [1, 0, 0], sizes = [1, 8, 96], strides = [1, 1, 1]} : vector<8x8x96xf32> to vector<1x8x96xf32>
    %248 = vector.shape_cast %247 : vector<1x8x96xf32> to vector<8x96xf32>
    %cst_54 = arith.constant dense<0.000000e+00> : vector<8x96xf32>
    %249 = tpu.matmul %246, %2, %cst_54 {dimension_numbers = #tpu.dot_dimension_numbers<[1], [0], [0], [1], [0, 0, 1, 1], [], []>} : vector<8x32xf32>, vector<32x96xf32>, vector<8x96xf32> -> vector<8x96xf32>
    %250 = vector.broadcast %3 : vector<1x96xf32> to vector<8x96xf32>
    %251 = arith.addf %249, %250 : vector<8x96xf32>
    %252 = arith.addf %248, %251 : vector<8x96xf32>
    %253 = vector.extract_strided_slice %252 {offsets = [0, 0], sizes = [8, 32], strides = [1, 1]} : vector<8x96xf32> to vector<8x32xf32>
    %254 = arith.negf %253 : vector<8x32xf32>
    %255 = math.exp %254 : vector<8x32xf32>
    %cst_55 = arith.constant 1.000000e+00 : f32
    %256 = vector.broadcast %cst_55 : f32 to vector<8x32xf32>
    %257 = arith.addf %256, %255 : vector<8x32xf32>
    %258 = arith.divf %256, %257 : vector<8x32xf32>
    %259 = vector.extract_strided_slice %252 {offsets = [0, 32], sizes = [8, 32], strides = [1, 1]} : vector<8x96xf32> to vector<8x32xf32>
    %260 = arith.negf %259 : vector<8x32xf32>
    %261 = math.exp %260 : vector<8x32xf32>
    %cst_56 = arith.constant 1.000000e+00 : f32
    %262 = vector.broadcast %cst_56 : f32 to vector<8x32xf32>
    %263 = arith.addf %262, %261 : vector<8x32xf32>
    %264 = arith.divf %262, %263 : vector<8x32xf32>
    %265 = vector.extract_strided_slice %248 {offsets = [0, 64], sizes = [8, 32], strides = [1, 1]} : vector<8x96xf32> to vector<8x32xf32>
    %266 = vector.extract_strided_slice %251 {offsets = [0, 64], sizes = [8, 32], strides = [1, 1]} : vector<8x96xf32> to vector<8x32xf32>
    %267 = arith.mulf %258, %266 : vector<8x32xf32>
    %268 = arith.addf %265, %267 : vector<8x32xf32>
    %269 = math.tanh %268 : vector<8x32xf32>
    %270 = arith.subf %246, %269 : vector<8x32xf32>
    %271 = arith.mulf %264, %270 : vector<8x32xf32>
    %272 = arith.addf %269, %271 : vector<8x32xf32>
    %273 = vector.extract_strided_slice %219 {offsets = [2, 0, 0], sizes = [1, 8, 96], strides = [1, 1, 1]} : vector<8x8x96xf32> to vector<1x8x96xf32>
    %274 = vector.shape_cast %273 : vector<1x8x96xf32> to vector<8x96xf32>
    %cst_57 = arith.constant dense<0.000000e+00> : vector<8x96xf32>
    %275 = tpu.matmul %272, %2, %cst_57 {dimension_numbers = #tpu.dot_dimension_numbers<[1], [0], [0], [1], [0, 0, 1, 1], [], []>} : vector<8x32xf32>, vector<32x96xf32>, vector<8x96xf32> -> vector<8x96xf32>
    %276 = vector.broadcast %3 : vector<1x96xf32> to vector<8x96xf32>
    %277 = arith.addf %275, %276 : vector<8x96xf32>
    %278 = arith.addf %274, %277 : vector<8x96xf32>
    %279 = vector.extract_strided_slice %278 {offsets = [0, 0], sizes = [8, 32], strides = [1, 1]} : vector<8x96xf32> to vector<8x32xf32>
    %280 = arith.negf %279 : vector<8x32xf32>
    %281 = math.exp %280 : vector<8x32xf32>
    %cst_58 = arith.constant 1.000000e+00 : f32
    %282 = vector.broadcast %cst_58 : f32 to vector<8x32xf32>
    %283 = arith.addf %282, %281 : vector<8x32xf32>
    %284 = arith.divf %282, %283 : vector<8x32xf32>
    %285 = vector.extract_strided_slice %278 {offsets = [0, 32], sizes = [8, 32], strides = [1, 1]} : vector<8x96xf32> to vector<8x32xf32>
    %286 = arith.negf %285 : vector<8x32xf32>
    %287 = math.exp %286 : vector<8x32xf32>
    %cst_59 = arith.constant 1.000000e+00 : f32
    %288 = vector.broadcast %cst_59 : f32 to vector<8x32xf32>
    %289 = arith.addf %288, %287 : vector<8x32xf32>
    %290 = arith.divf %288, %289 : vector<8x32xf32>
    %291 = vector.extract_strided_slice %274 {offsets = [0, 64], sizes = [8, 32], strides = [1, 1]} : vector<8x96xf32> to vector<8x32xf32>
    %292 = vector.extract_strided_slice %277 {offsets = [0, 64], sizes = [8, 32], strides = [1, 1]} : vector<8x96xf32> to vector<8x32xf32>
    %293 = arith.mulf %284, %292 : vector<8x32xf32>
    %294 = arith.addf %291, %293 : vector<8x32xf32>
    %295 = math.tanh %294 : vector<8x32xf32>
    %296 = arith.subf %272, %295 : vector<8x32xf32>
    %297 = arith.mulf %290, %296 : vector<8x32xf32>
    %298 = arith.addf %295, %297 : vector<8x32xf32>
    %299 = vector.extract_strided_slice %219 {offsets = [3, 0, 0], sizes = [1, 8, 96], strides = [1, 1, 1]} : vector<8x8x96xf32> to vector<1x8x96xf32>
    %300 = vector.shape_cast %299 : vector<1x8x96xf32> to vector<8x96xf32>
    %cst_60 = arith.constant dense<0.000000e+00> : vector<8x96xf32>
    %301 = tpu.matmul %298, %2, %cst_60 {dimension_numbers = #tpu.dot_dimension_numbers<[1], [0], [0], [1], [0, 0, 1, 1], [], []>} : vector<8x32xf32>, vector<32x96xf32>, vector<8x96xf32> -> vector<8x96xf32>
    %302 = vector.broadcast %3 : vector<1x96xf32> to vector<8x96xf32>
    %303 = arith.addf %301, %302 : vector<8x96xf32>
    %304 = arith.addf %300, %303 : vector<8x96xf32>
    %305 = vector.extract_strided_slice %304 {offsets = [0, 0], sizes = [8, 32], strides = [1, 1]} : vector<8x96xf32> to vector<8x32xf32>
    %306 = arith.negf %305 : vector<8x32xf32>
    %307 = math.exp %306 : vector<8x32xf32>
    %cst_61 = arith.constant 1.000000e+00 : f32
    %308 = vector.broadcast %cst_61 : f32 to vector<8x32xf32>
    %309 = arith.addf %308, %307 : vector<8x32xf32>
    %310 = arith.divf %308, %309 : vector<8x32xf32>
    %311 = vector.extract_strided_slice %304 {offsets = [0, 32], sizes = [8, 32], strides = [1, 1]} : vector<8x96xf32> to vector<8x32xf32>
    %312 = arith.negf %311 : vector<8x32xf32>
    %313 = math.exp %312 : vector<8x32xf32>
    %cst_62 = arith.constant 1.000000e+00 : f32
    %314 = vector.broadcast %cst_62 : f32 to vector<8x32xf32>
    %315 = arith.addf %314, %313 : vector<8x32xf32>
    %316 = arith.divf %314, %315 : vector<8x32xf32>
    %317 = vector.extract_strided_slice %300 {offsets = [0, 64], sizes = [8, 32], strides = [1, 1]} : vector<8x96xf32> to vector<8x32xf32>
    %318 = vector.extract_strided_slice %303 {offsets = [0, 64], sizes = [8, 32], strides = [1, 1]} : vector<8x96xf32> to vector<8x32xf32>
    %319 = arith.mulf %310, %318 : vector<8x32xf32>
    %320 = arith.addf %317, %319 : vector<8x32xf32>
    %321 = math.tanh %320 : vector<8x32xf32>
    %322 = arith.subf %298, %321 : vector<8x32xf32>
    %323 = arith.mulf %316, %322 : vector<8x32xf32>
    %324 = arith.addf %321, %323 : vector<8x32xf32>
    %325 = vector.extract_strided_slice %219 {offsets = [4, 0, 0], sizes = [1, 8, 96], strides = [1, 1, 1]} : vector<8x8x96xf32> to vector<1x8x96xf32>
    %326 = vector.shape_cast %325 : vector<1x8x96xf32> to vector<8x96xf32>
    %cst_63 = arith.constant dense<0.000000e+00> : vector<8x96xf32>
    %327 = tpu.matmul %324, %2, %cst_63 {dimension_numbers = #tpu.dot_dimension_numbers<[1], [0], [0], [1], [0, 0, 1, 1], [], []>} : vector<8x32xf32>, vector<32x96xf32>, vector<8x96xf32> -> vector<8x96xf32>
    %328 = vector.broadcast %3 : vector<1x96xf32> to vector<8x96xf32>
    %329 = arith.addf %327, %328 : vector<8x96xf32>
    %330 = arith.addf %326, %329 : vector<8x96xf32>
    %331 = vector.extract_strided_slice %330 {offsets = [0, 0], sizes = [8, 32], strides = [1, 1]} : vector<8x96xf32> to vector<8x32xf32>
    %332 = arith.negf %331 : vector<8x32xf32>
    %333 = math.exp %332 : vector<8x32xf32>
    %cst_64 = arith.constant 1.000000e+00 : f32
    %334 = vector.broadcast %cst_64 : f32 to vector<8x32xf32>
    %335 = arith.addf %334, %333 : vector<8x32xf32>
    %336 = arith.divf %334, %335 : vector<8x32xf32>
    %337 = vector.extract_strided_slice %330 {offsets = [0, 32], sizes = [8, 32], strides = [1, 1]} : vector<8x96xf32> to vector<8x32xf32>
    %338 = arith.negf %337 : vector<8x32xf32>
    %339 = math.exp %338 : vector<8x32xf32>
    %cst_65 = arith.constant 1.000000e+00 : f32
    %340 = vector.broadcast %cst_65 : f32 to vector<8x32xf32>
    %341 = arith.addf %340, %339 : vector<8x32xf32>
    %342 = arith.divf %340, %341 : vector<8x32xf32>
    %343 = vector.extract_strided_slice %326 {offsets = [0, 64], sizes = [8, 32], strides = [1, 1]} : vector<8x96xf32> to vector<8x32xf32>
    %344 = vector.extract_strided_slice %329 {offsets = [0, 64], sizes = [8, 32], strides = [1, 1]} : vector<8x96xf32> to vector<8x32xf32>
    %345 = arith.mulf %336, %344 : vector<8x32xf32>
    %346 = arith.addf %343, %345 : vector<8x32xf32>
    %347 = math.tanh %346 : vector<8x32xf32>
    %348 = arith.subf %324, %347 : vector<8x32xf32>
    %349 = arith.mulf %342, %348 : vector<8x32xf32>
    %350 = arith.addf %347, %349 : vector<8x32xf32>
    %351 = vector.extract_strided_slice %219 {offsets = [5, 0, 0], sizes = [1, 8, 96], strides = [1, 1, 1]} : vector<8x8x96xf32> to vector<1x8x96xf32>
    %352 = vector.shape_cast %351 : vector<1x8x96xf32> to vector<8x96xf32>
    %cst_66 = arith.constant dense<0.000000e+00> : vector<8x96xf32>
    %353 = tpu.matmul %350, %2, %cst_66 {dimension_numbers = #tpu.dot_dimension_numbers<[1], [0], [0], [1], [0, 0, 1, 1], [], []>} : vector<8x32xf32>, vector<32x96xf32>, vector<8x96xf32> -> vector<8x96xf32>
    %354 = vector.broadcast %3 : vector<1x96xf32> to vector<8x96xf32>
    %355 = arith.addf %353, %354 : vector<8x96xf32>
    %356 = arith.addf %352, %355 : vector<8x96xf32>
    %357 = vector.extract_strided_slice %356 {offsets = [0, 0], sizes = [8, 32], strides = [1, 1]} : vector<8x96xf32> to vector<8x32xf32>
    %358 = arith.negf %357 : vector<8x32xf32>
    %359 = math.exp %358 : vector<8x32xf32>
    %cst_67 = arith.constant 1.000000e+00 : f32
    %360 = vector.broadcast %cst_67 : f32 to vector<8x32xf32>
    %361 = arith.addf %360, %359 : vector<8x32xf32>
    %362 = arith.divf %360, %361 : vector<8x32xf32>
    %363 = vector.extract_strided_slice %356 {offsets = [0, 32], sizes = [8, 32], strides = [1, 1]} : vector<8x96xf32> to vector<8x32xf32>
    %364 = arith.negf %363 : vector<8x32xf32>
    %365 = math.exp %364 : vector<8x32xf32>
    %cst_68 = arith.constant 1.000000e+00 : f32
    %366 = vector.broadcast %cst_68 : f32 to vector<8x32xf32>
    %367 = arith.addf %366, %365 : vector<8x32xf32>
    %368 = arith.divf %366, %367 : vector<8x32xf32>
    %369 = vector.extract_strided_slice %352 {offsets = [0, 64], sizes = [8, 32], strides = [1, 1]} : vector<8x96xf32> to vector<8x32xf32>
    %370 = vector.extract_strided_slice %355 {offsets = [0, 64], sizes = [8, 32], strides = [1, 1]} : vector<8x96xf32> to vector<8x32xf32>
    %371 = arith.mulf %362, %370 : vector<8x32xf32>
    %372 = arith.addf %369, %371 : vector<8x32xf32>
    %373 = math.tanh %372 : vector<8x32xf32>
    %374 = arith.subf %350, %373 : vector<8x32xf32>
    %375 = arith.mulf %368, %374 : vector<8x32xf32>
    %376 = arith.addf %373, %375 : vector<8x32xf32>
    %377 = vector.extract_strided_slice %219 {offsets = [6, 0, 0], sizes = [1, 8, 96], strides = [1, 1, 1]} : vector<8x8x96xf32> to vector<1x8x96xf32>
    %378 = vector.shape_cast %377 : vector<1x8x96xf32> to vector<8x96xf32>
    %cst_69 = arith.constant dense<0.000000e+00> : vector<8x96xf32>
    %379 = tpu.matmul %376, %2, %cst_69 {dimension_numbers = #tpu.dot_dimension_numbers<[1], [0], [0], [1], [0, 0, 1, 1], [], []>} : vector<8x32xf32>, vector<32x96xf32>, vector<8x96xf32> -> vector<8x96xf32>
    %380 = vector.broadcast %3 : vector<1x96xf32> to vector<8x96xf32>
    %381 = arith.addf %379, %380 : vector<8x96xf32>
    %382 = arith.addf %378, %381 : vector<8x96xf32>
    %383 = vector.extract_strided_slice %382 {offsets = [0, 0], sizes = [8, 32], strides = [1, 1]} : vector<8x96xf32> to vector<8x32xf32>
    %384 = arith.negf %383 : vector<8x32xf32>
    %385 = math.exp %384 : vector<8x32xf32>
    %cst_70 = arith.constant 1.000000e+00 : f32
    %386 = vector.broadcast %cst_70 : f32 to vector<8x32xf32>
    %387 = arith.addf %386, %385 : vector<8x32xf32>
    %388 = arith.divf %386, %387 : vector<8x32xf32>
    %389 = vector.extract_strided_slice %382 {offsets = [0, 32], sizes = [8, 32], strides = [1, 1]} : vector<8x96xf32> to vector<8x32xf32>
    %390 = arith.negf %389 : vector<8x32xf32>
    %391 = math.exp %390 : vector<8x32xf32>
    %cst_71 = arith.constant 1.000000e+00 : f32
    %392 = vector.broadcast %cst_71 : f32 to vector<8x32xf32>
    %393 = arith.addf %392, %391 : vector<8x32xf32>
    %394 = arith.divf %392, %393 : vector<8x32xf32>
    %395 = vector.extract_strided_slice %378 {offsets = [0, 64], sizes = [8, 32], strides = [1, 1]} : vector<8x96xf32> to vector<8x32xf32>
    %396 = vector.extract_strided_slice %381 {offsets = [0, 64], sizes = [8, 32], strides = [1, 1]} : vector<8x96xf32> to vector<8x32xf32>
    %397 = arith.mulf %388, %396 : vector<8x32xf32>
    %398 = arith.addf %395, %397 : vector<8x32xf32>
    %399 = math.tanh %398 : vector<8x32xf32>
    %400 = arith.subf %376, %399 : vector<8x32xf32>
    %401 = arith.mulf %394, %400 : vector<8x32xf32>
    %402 = arith.addf %399, %401 : vector<8x32xf32>
    %403 = vector.extract_strided_slice %219 {offsets = [7, 0, 0], sizes = [1, 8, 96], strides = [1, 1, 1]} : vector<8x8x96xf32> to vector<1x8x96xf32>
    %404 = vector.shape_cast %403 : vector<1x8x96xf32> to vector<8x96xf32>
    %cst_72 = arith.constant dense<0.000000e+00> : vector<8x96xf32>
    %405 = tpu.matmul %402, %2, %cst_72 {dimension_numbers = #tpu.dot_dimension_numbers<[1], [0], [0], [1], [0, 0, 1, 1], [], []>} : vector<8x32xf32>, vector<32x96xf32>, vector<8x96xf32> -> vector<8x96xf32>
    %406 = vector.broadcast %3 : vector<1x96xf32> to vector<8x96xf32>
    %407 = arith.addf %405, %406 : vector<8x96xf32>
    %408 = arith.addf %404, %407 : vector<8x96xf32>
    %409 = vector.extract_strided_slice %408 {offsets = [0, 0], sizes = [8, 32], strides = [1, 1]} : vector<8x96xf32> to vector<8x32xf32>
    %410 = arith.negf %409 : vector<8x32xf32>
    %411 = math.exp %410 : vector<8x32xf32>
    %cst_73 = arith.constant 1.000000e+00 : f32
    %412 = vector.broadcast %cst_73 : f32 to vector<8x32xf32>
    %413 = arith.addf %412, %411 : vector<8x32xf32>
    %414 = arith.divf %412, %413 : vector<8x32xf32>
    %415 = vector.extract_strided_slice %408 {offsets = [0, 32], sizes = [8, 32], strides = [1, 1]} : vector<8x96xf32> to vector<8x32xf32>
    %416 = arith.negf %415 : vector<8x32xf32>
    %417 = math.exp %416 : vector<8x32xf32>
    %cst_74 = arith.constant 1.000000e+00 : f32
    %418 = vector.broadcast %cst_74 : f32 to vector<8x32xf32>
    %419 = arith.addf %418, %417 : vector<8x32xf32>
    %420 = arith.divf %418, %419 : vector<8x32xf32>
    %421 = vector.extract_strided_slice %404 {offsets = [0, 64], sizes = [8, 32], strides = [1, 1]} : vector<8x96xf32> to vector<8x32xf32>
    %422 = vector.extract_strided_slice %407 {offsets = [0, 64], sizes = [8, 32], strides = [1, 1]} : vector<8x96xf32> to vector<8x32xf32>
    %423 = arith.mulf %414, %422 : vector<8x32xf32>
    %424 = arith.addf %421, %423 : vector<8x32xf32>
    %425 = math.tanh %424 : vector<8x32xf32>
    %426 = arith.subf %402, %425 : vector<8x32xf32>
    %427 = arith.mulf %420, %426 : vector<8x32xf32>
    %428 = arith.addf %425, %427 : vector<8x32xf32>
    %429 = tpu.concatenate %246, %272, %298, %324, %350, %376, %402, %428 in 0 : vector<8x32xf32>, vector<8x32xf32>, vector<8x32xf32>, vector<8x32xf32>, vector<8x32xf32>, vector<8x32xf32>, vector<8x32xf32>, vector<8x32xf32> -> vector<64x32xf32>
    %c0_75 = arith.constant 0 : index
    %c0_76 = arith.constant 0 : index
    %430 = vector.load %arg11[%c0_75, %c0_76] : memref<32x16xf32, #tpu.memory_space<vmem>>, vector<32x16xf32>
    %cst_77 = arith.constant dense<0.000000e+00> : vector<64x16xf32>
    %431 = tpu.matmul %429, %430, %cst_77 {dimension_numbers = #tpu.dot_dimension_numbers<[1], [0], [0], [1], [0, 0, 1, 1], [], []>} : vector<64x32xf32>, vector<32x16xf32>, vector<64x16xf32> -> vector<64x16xf32>
    %c0_78 = arith.constant 0 : index
    %c0_79 = arith.constant 0 : index
    %432 = vector.load %arg12[%c0_78, %c0_79] : memref<1x16xf32, #tpu.memory_space<vmem>>, vector<1x16xf32>
    %433 = vector.broadcast %432 : vector<1x16xf32> to vector<64x16xf32>
    %434 = arith.addf %431, %433 : vector<64x16xf32>
    %cst_80 = arith.constant 0.000000e+00 : f32
    %435 = vector.broadcast %cst_80 : f32 to vector<64x16xf32>
    %436 = arith.cmpf ogt, %434, %435 : vector<64x16xf32>
    %cst_81 = arith.constant 2.000000e-01 : f32
    %437 = vector.broadcast %cst_81 : f32 to vector<64x16xf32>
    %438 = arith.mulf %437, %434 : vector<64x16xf32>
    %439 = arith.select %436, %434, %438 : vector<64x16xi1>, vector<64x16xf32>
    %c0_82 = arith.constant 0 : index
    %c0_83 = arith.constant 0 : index
    %440 = vector.load %arg13[%c0_82, %c0_83] : memref<16x128xf32, #tpu.memory_space<vmem>>, vector<16x128xf32>
    %cst_84 = arith.constant dense<0.000000e+00> : vector<64x128xf32>
    %441 = tpu.matmul %439, %440, %cst_84 {dimension_numbers = #tpu.dot_dimension_numbers<[1], [0], [0], [1], [0, 0, 1, 1], [], []>} : vector<64x16xf32>, vector<16x128xf32>, vector<64x128xf32> -> vector<64x128xf32>
    %c0_85 = arith.constant 0 : index
    %c0_86 = arith.constant 0 : index
    %442 = vector.load %arg14[%c0_85, %c0_86] : memref<1x128xf32, #tpu.memory_space<vmem>>, vector<1x128xf32>
    %443 = vector.broadcast %442 : vector<1x128xf32> to vector<64x128xf32>
    %444 = arith.addf %441, %443 : vector<64x128xf32>
    %445 = math.tanh %444 : vector<64x128xf32>
    %446 = vector.shape_cast %445 : vector<64x128xf32> to vector<8x8x128xf32>
    %447 = tpu.transpose %446, [1, 0, 2] : vector<8x8x128xf32> -> vector<8x8x128xf32>
    %c0_87 = arith.constant 0 : index
    %c0_88 = arith.constant 0 : index
    %c0_89 = arith.constant 0 : index
    %448 = vector.load %arg15[%c0_87, %c0_88, %c0_89] : memref<8x8x128xf32, #tpu.memory_space<vmem>>, vector<8x8x128xf32>
    tpu.vector_store %arg15[%c0_87, %c0_88, %c0_89], %447 {strides = array<i32>} : memref<8x8x128xf32, #tpu.memory_space<vmem>>, vector<8x8x128xf32>,
    return
  }
}

</mosaic_0001>

<bundles_post_ra>
// kernel: _lambda_.1
= control target key start
LH: loop header
LB: loop body
LE: loop exit
PB: predicated region body
PF: predicated region fallthrough
CT: control target
= control target key end

     0   :  { %s4299_s0 = inlined_call_operand.hbm [shape: f32[8,16], index: 0, kind: input, shape index: {}]   ;;  %s4300_s1 = inlined_call_operand.hbm [shape: f32[16,32], index: 1, kind: input, shape index: {}]   ;;  %s4301_s2 = inlined_call_operand.hbm [shape: f32[1,32], index: 2, kind: input, shape index: {}]   ;;  %s4302_s3 = inlined_call_operand.hbm [shape: f32[32,96], index: 3, kind: input, shape index: {}]   ;;  %s4303_s4 = inlined_call_operand.hbm [shape: f32[32,96], index: 4, kind: input, shape index: {}]   ;;  %s4304_s5 = inlined_call_operand.hbm [shape: f32[1,96], index: 5, kind: input, shape index: {}]   ;;  %s4305_s6 = inlined_call_operand.hbm [shape: f32[1,96], index: 6, kind: input, shape index: {}]   ;;  %s4306_s7 = inlined_call_operand.hbm [shape: f32[32,96], index: 7, kind: input, shape index: {}]   ;;  %s4307_s8 = inlined_call_operand.hbm [shape: f32[32,96], index: 8, kind: input, shape index: {}]   ;;  %s4308_s9 = inlined_call_operand.hbm [shape: f32[1,96], index: 9, kind: input, shape index: {}]   ;;  %s4309_s10 = inlined_call_operand.hbm [shape: f32[1,96], index: 10, kind: input, shape index: {}]   ;;  %s4310_s11 = inlined_call_operand.vmem [shape: f32[32,16], index: 11, kind: input, shape index: {}]   ;;  %s4311_s12 = inlined_call_operand.hbm [shape: f32[1,16], index: 12, kind: input, shape index: {}]   ;;  %s4312_s13 = inlined_call_operand.vmem [shape: f32[16,128], index: 13, kind: input, shape index: {}]   ;;  %s4313_s14 = inlined_call_operand.vmem [shape: f32[1,128], index: 14, kind: input, shape index: {}]   ;;  %s4314_s15 = inlined_call_operand.vmem [shape: f32[8,8,128], index: 15, kind: output, shape index: {}]  }
   0x1   :  { %4316 = sst [smem:[#allocation28_spill]] %s4314_s15 }
   0x2   :  { %20 = vsyncpa [#allocation3], 0 }
   0x3   :  { %21 = vsyncpa [#allocation5], 0 }
   0x4   :  { %22 = vsyncpa [#allocation8], 0 }
   0x5   :  { %23 = vsyncpa [#allocation11], 0 }
   0x6   :  { %24 = vsyncpa [#allocation14], 0 }
   0x7   :  { %25 = vsyncpa [#allocation17], 0 }
   0x8   :  { %26 = vsyncpa [#allocation20], 0  ;;  %s3589_s18 = smov [#allocation4]   ;;  %s3311_s22 = scalar_lea.hbm %s4300_s1, 256 }
   0x9   :  { %s42_s19 = sshll.u32 %s3589_s18, 4  ;;  %p3312_p0 = scmp.ne.s32.totalorder %s4300_s1, %s3311_s22  ;;  %s43_s19 = int_to_ptr.vmem [resolvable:$true] %s42_s19 }
   0xa   :  { %p3315_p1 = scmp.lt.u32.totalorder %s3311_s22, %s4300_s1 }
   0xc   :  { %p3317_p2 = pnand %p3315_p1, %p3312_p0 }
   0xe   :  { %3320 = shalt.err (!%p3317_p2)
}
   0xf   :  { %s3321_s27 = scalar_lea.vmem %s43_s19, 256  ;;  %p3326_p4 = scmp.lt.s32.totalorder %s43_s19, %s43_s19 }
  0x10   :  { %p3322_p3 = scmp.ne.s32.totalorder %s43_s19, %s3321_s27  ;;  %p3327_p5 = scmp.lt.s32.totalorder %s3321_s27, %s3321_s27 }
  0x12   :  { %p3328_p6 = por %p3327_p5, %p3326_p4 }
  0x14   :  { %p3329_p7 = pnand %p3328_p6, %p3322_p3 }
  0x16   :  { %3332 = shalt.err (!%p3329_p7)
}
  0x17   :  { %s3590_s28 = smov 128   ;;  %s3591_s29 = smov 8  }
  0x18   :  { %48 = dma.hbm_to_vmem [thread:$0]  %s4300_s1, 256, %s43_s19, [#allocation5], %s3590_s28, %s3590_s28, %s3591_s29  }
  0x19   :  { %s3592_s17 = smov [#allocation7]   ;;  %s3593_s20 = smov [#allocation10]  }
  0x1a   :  { %s64_s18 = sshll.u32 %s3592_s17, 4  ;;  %s89_s21 = sshll.u32 %s3593_s20, 4  ;;  %s65_s18 = int_to_ptr.vmem [resolvable:$true] %s64_s18  ;;  %s90_s21 = int_to_ptr.vmem [resolvable:$true] %s89_s21 }
  0x1b   :  { %s3333_s24 = scalar_lea.hbm %s4302_s3, 512 }
  0x1c   :  { %p3334_p8 = scmp.ne.s32.totalorder %s4302_s3, %s3333_s24  ;;  %p3337_p9 = scmp.lt.u32.totalorder %s3333_s24, %s4302_s3 }
  0x1e   :  { %p3339_p10 = pnand %p3337_p9, %p3334_p8 }
  0x20   :  { %3342 = shalt.err (!%p3339_p10)
}
  0x21   :  { %s3343_s1 = scalar_lea.vmem %s65_s18, 512  ;;  %p3348_p12 = scmp.lt.s32.totalorder %s65_s18, %s65_s18 }
  0x22   :  { %p3344_p11 = scmp.ne.s32.totalorder %s65_s18, %s3343_s1  ;;  %p3349_p13 = scmp.lt.s32.totalorder %s3343_s1, %s3343_s1 }
  0x24   :  { %p3350_p0 = por %p3349_p13, %p3348_p12 }
  0x26   :  { %p3351_p1 = pnand %p3350_p0, %p3344_p11 }
  0x28   :  { %3354 = shalt.err (!%p3351_p1)
}
  0x29   :  { %70 = dma.hbm_to_vmem [thread:$0]  %s4302_s3, 512, %s65_s18, [#allocation8], %s3590_s28, %s3590_s28, %s3591_s29  }
  0x2a   :  { %s3355_s17 = scalar_lea.hbm %s4304_s5, 16 }
  0x2b   :  { %p3356_p2 = scmp.ne.s32.totalorder %s4304_s5, %s3355_s17  ;;  %p3359_p3 = scmp.lt.u32.totalorder %s3355_s17, %s4304_s5 }
  0x2d   :  { %p3361_p4 = pnand %p3359_p3, %p3356_p2 }
  0x2f   :  { %3364 = shalt.err (!%p3361_p4)
}
  0x30   :  { %s3365_s25 = scalar_lea.vmem %s90_s21, 16  ;;  %s3369_s26 = scalar_lea.vmem %s90_s21, 32 }
  0x31   :  { %p3366_p5 = scmp.ne.s32.totalorder %s90_s21, %s3365_s25  ;;  %p3370_p6 = scmp.lt.s32.totalorder %s90_s21, %s90_s21 }
  0x32   :  { %p3371_p7 = scmp.lt.s32.totalorder %s3369_s26, %s3365_s25 }
  0x34   :  { %p3372_p8 = por %p3371_p7, %p3370_p6 }
  0x36   :  { %p3373_p9 = pnand %p3372_p8, %p3366_p5 }
  0x38   :  { %3376 = shalt.err (!%p3373_p9)
}
  0x39   :  { %92 = dma.hbm_to_vmem [thread:$0]  %s4304_s5, 16, %s90_s21, [#allocation11]  }
  0x3a   :  { %s3594_s27 = smov [#allocation13]   ;;  %s3595_s19 = smov [#allocation16]  }
  0x3b   :  { %s108_s1 = sshll.u32 %s3594_s27, 4  ;;  %s133_s30 = sshll.u32 %s3595_s19, 4  ;;  %s109_s1 = int_to_ptr.vmem [resolvable:$true] %s108_s1  ;;  %s134_s30 = int_to_ptr.vmem [resolvable:$true] %s133_s30 }
  0x3c   :  { %s3377_s17 = scalar_lea.hbm %s4306_s7, 512 }
  0x3d   :  { %p3378_p10 = scmp.ne.s32.totalorder %s4306_s7, %s3377_s17  ;;  %p3381_p11 = scmp.lt.u32.totalorder %s3377_s17, %s4306_s7 }
  0x3f   :  { %p3383_p12 = pnand %p3381_p11, %p3378_p10 }
  0x41   :  { %3386 = shalt.err (!%p3383_p12)
}
  0x42   :  { %s3387_s5 = scalar_lea.vmem %s109_s1, 512  ;;  %p3392_p0 = scmp.lt.s32.totalorder %s109_s1, %s109_s1 }
  0x43   :  { %p3388_p13 = scmp.ne.s32.totalorder %s109_s1, %s3387_s5  ;;  %p3393_p1 = scmp.lt.s32.totalorder %s3387_s5, %s3387_s5 }
  0x45   :  { %p3394_p2 = por %p3393_p1, %p3392_p0 }
  0x47   :  { %p3395_p3 = pnand %p3394_p2, %p3388_p13 }
  0x49   :  { %3398 = shalt.err (!%p3395_p3)
}
  0x4a   :  { %114 = dma.hbm_to_vmem [thread:$0]  %s4306_s7, 512, %s109_s1, [#allocation14], %s3590_s28, %s3590_s28, %s3591_s29  }
  0x4b   :  { %s3399_s18 = scalar_lea.hbm %s4308_s9, 16 }
  0x4c   :  { %p3400_p4 = scmp.ne.s32.totalorder %s4308_s9, %s3399_s18  ;;  %p3403_p5 = scmp.lt.u32.totalorder %s3399_s18, %s4308_s9 }
  0x4e   :  { %p3405_p6 = pnand %p3403_p5, %p3400_p4 }
  0x50   :  { %3408 = shalt.err (!%p3405_p6)
}
  0x51   :  { %s3409_s17 = scalar_lea.vmem %s134_s30, 16  ;;  %s3413_s20 = scalar_lea.vmem %s134_s30, 32 }
  0x52   :  { %p3410_p7 = scmp.ne.s32.totalorder %s134_s30, %s3409_s17  ;;  %p3414_p8 = scmp.lt.s32.totalorder %s134_s30, %s134_s30 }
  0x53   :  { %p3415_p9 = scmp.lt.s32.totalorder %s3413_s20, %s3409_s17 }
  0x55   :  { %p3416_p10 = por %p3415_p9, %p3414_p8 }
  0x57   :  { %p3417_p11 = pnand %p3416_p10, %p3410_p7 }
  0x59   :  { %3420 = shalt.err (!%p3417_p11)
}
  0x5a   :  { %136 = dma.hbm_to_vmem [thread:$0]  %s4308_s9, 16, %s134_s30, [#allocation17]  }
  0x5b   :  { %s3596_s22 = smov [#allocation2]   ;;  %s3597_s24 = smov [#allocation6]  }
  0x5c   :  { %s33_s23 = sshll.u32 %s3596_s22, 4  ;;  %s55_s5 = sshll.u32 %s3597_s24, 4  ;;  %s34_s23 = int_to_ptr.vmem [resolvable:$true] %s33_s23  ;;  %s56_s5 = int_to_ptr.vmem [resolvable:$true] %s55_s5 }
  0x5d   :  { %s3421_s26 = scalar_lea.hbm %s4299_s0, 128 }
  0x5e   :  { %p3422_p12 = scmp.ne.s32.totalorder %s4299_s0, %s3421_s26  ;;  %p3425_p13 = scmp.lt.u32.totalorder %s3421_s26, %s4299_s0 }
  0x60   :  { %p3427_p0 = pnand %p3425_p13, %p3422_p12 }
  0x62   :  { %3430 = shalt.err (!%p3427_p0)
}
  0x63   :  { %s3431_s9 = scalar_lea.vmem %s34_s23, 128  ;;  %p3436_p2 = scmp.lt.s32.totalorder %s34_s23, %s34_s23 }
  0x64   :  { %p3432_p1 = scmp.ne.s32.totalorder %s34_s23, %s3431_s9  ;;  %p3437_p3 = scmp.lt.s32.totalorder %s3431_s9, %s3431_s9 }
  0x66   :  { %p3438_p4 = por %p3437_p3, %p3436_p2 }
  0x68   :  { %p3439_p5 = pnand %p3438_p4, %p3432_p1 }
  0x6a   :  { %3442 = shalt.err (!%p3439_p5)
}
  0x6b   :  { %36 = dma.hbm_to_vmem [thread:$0]  %s4299_s0, 128, %s34_s23, [#allocation3]  }
  0x6c   :  { %s3443_s20 = scalar_lea.hbm %s4301_s2, 16 }
  0x6d   :  { %p3444_p6 = scmp.ne.s32.totalorder %s4301_s2, %s3443_s20  ;;  %p3447_p7 = scmp.lt.u32.totalorder %s3443_s20, %s4301_s2 }
  0x6f   :  { %p3449_p8 = pnand %p3447_p7, %p3444_p6 }
  0x71   :  { %3452 = shalt.err (!%p3449_p8)
}
  0x72   :  { %s3453_s21 = scalar_lea.vmem %s56_s5, 16  ;;  %s3457_s25 = scalar_lea.vmem %s56_s5, 32 }
  0x73   :  { %p3454_p9 = scmp.ne.s32.totalorder %s56_s5, %s3453_s21  ;;  %p3458_p10 = scmp.lt.s32.totalorder %s56_s5, %s56_s5 }
  0x74   :  { %p3459_p11 = scmp.lt.s32.totalorder %s3457_s25, %s3453_s21 }
  0x76   :  { %p3460_p12 = por %p3459_p11, %p3458_p10 }
  0x78   :  { %p3461_p13 = pnand %p3460_p12, %p3454_p9 }
  0x7a   :  { %3464 = shalt.err (!%p3461_p13)
}
  0x7b   :  { %58 = dma.hbm_to_vmem [thread:$0]  %s4301_s2, 16, %s56_s5, [#allocation5]  }
  0x7c   :  { %s3598_s26 = smov [#allocation9]   ;;  %s3599_s18 = smov [#allocation12]  }
  0x7d   :  { %s76_s3 = sshll.u32 %s3598_s26, 4  ;;  %s99_s27 = sshll.u32 %s3599_s18, 4  ;;  %s77_s3 = int_to_ptr.vmem [resolvable:$true] %s76_s3  ;;  %s100_s27 = int_to_ptr.vmem [resolvable:$true] %s99_s27 }
  0x7e   :  { %s3465_s30 = scalar_lea.hbm %s4303_s4, 512 }
  0x7f   :  { %p3466_p0 = scmp.ne.s32.totalorder %s4303_s4, %s3465_s30  ;;  %p3469_p1 = scmp.lt.u32.totalorder %s3465_s30, %s4303_s4 }
  0x81   :  { %p3471_p2 = pnand %p3469_p1, %p3466_p0 }
  0x83   :  { %3474 = shalt.err (!%p3471_p2)
}
  0x84   :  { %s3475_s2 = scalar_lea.vmem %s77_s3, 512  ;;  %p3480_p4 = scmp.lt.s32.totalorder %s77_s3, %s77_s3 }
  0x85   :  { %p3476_p3 = scmp.ne.s32.totalorder %s77_s3, %s3475_s2  ;;  %p3481_p5 = scmp.lt.s32.totalorder %s3475_s2, %s3475_s2 }
  0x87   :  { %p3482_p6 = por %p3481_p5, %p3480_p4 }
  0x89   :  { %p3483_p7 = pnand %p3482_p6, %p3476_p3 }
  0x8b   :  { %3486 = shalt.err (!%p3483_p7)
}
  0x8c   :  { %82 = dma.hbm_to_vmem [thread:$0]  %s4303_s4, 512, %s77_s3, [#allocation8], %s3590_s28, %s3590_s28, %s3591_s29  }
  0x8d   :  { %s3487_s24 = scalar_lea.hbm %s4305_s6, 16 }
  0x8e   :  { %p3488_p8 = scmp.ne.s32.totalorder %s4305_s6, %s3487_s24  ;;  %p3491_p9 = scmp.lt.u32.totalorder %s3487_s24, %s4305_s6 }
  0x90   :  { %p3493_p10 = pnand %p3491_p9, %p3488_p8 }
  0x92   :  { %3496 = shalt.err (!%p3493_p10)
}
  0x93   :  { %s3497_s26 = scalar_lea.vmem %s100_s27, 16  ;;  %s3501_s18 = scalar_lea.vmem %s100_s27, 32 }
  0x94   :  { %p3498_p11 = scmp.ne.s32.totalorder %s100_s27, %s3497_s26  ;;  %p3502_p12 = scmp.lt.s32.totalorder %s100_s27, %s100_s27 }
  0x95   :  { %p3503_p13 = scmp.lt.s32.totalorder %s3501_s18, %s3497_s26 }
  0x97   :  { %p3504_p0 = por %p3503_p13, %p3502_p12 }
  0x99   :  { %p3505_p1 = pnand %p3504_p0, %p3498_p11 }
  0x9b   :  { %3508 = shalt.err (!%p3505_p1)
}
  0x9c   :  { %102 = dma.hbm_to_vmem [thread:$0]  %s4305_s6, 16, %s100_s27, [#allocation11]  }
  0x9d   :  { %s3600_s19 = smov [#allocation15]   ;;  %s3601_s30 = smov [#allocation18]  }
  0x9e   :  { %s120_s9 = sshll.u32 %s3600_s19, 4  ;;  %s143_s16 = sshll.u32 %s3601_s30, 4  ;;  %s121_s9 = int_to_ptr.vmem [resolvable:$true] %s120_s9  ;;  %s144_s16 = int_to_ptr.vmem [resolvable:$true] %s143_s16 }
  0x9f   :  { %s3509_s20 = scalar_lea.hbm %s4307_s8, 512 }
  0xa0   :  { %p3510_p2 = scmp.ne.s32.totalorder %s4307_s8, %s3509_s20  ;;  %p3513_p3 = scmp.lt.u32.totalorder %s3509_s20, %s4307_s8 }
  0xa2   :  { %p3515_p4 = pnand %p3513_p3, %p3510_p2 }
  0xa4   :  { %3518 = shalt.err (!%p3515_p4)
}
  0xa5   :  { %s3519_s6 = scalar_lea.vmem %s121_s9, 512  ;;  %p3524_p6 = scmp.lt.s32.totalorder %s121_s9, %s121_s9 }
  0xa6   :  { %p3520_p5 = scmp.ne.s32.totalorder %s121_s9, %s3519_s6  ;;  %p3525_p7 = scmp.lt.s32.totalorder %s3519_s6, %s3519_s6 }
  0xa8   :  { %p3526_p8 = por %p3525_p7, %p3524_p6 }
  0xaa   :  { %p3527_p9 = pnand %p3526_p8, %p3520_p5 }
  0xac   :  { %3530 = shalt.err (!%p3527_p9)
}
  0xad   :  { %126 = dma.hbm_to_vmem [thread:$0]  %s4307_s8, 512, %s121_s9, [#allocation14], %s3590_s28, %s3590_s28, %s3591_s29  }
  0xae   :  { %s3531_s25 = scalar_lea.hbm %s4309_s10, 16 }
  0xaf   :  { %p3532_p10 = scmp.ne.s32.totalorder %s4309_s10, %s3531_s25  ;;  %p3535_p11 = scmp.lt.u32.totalorder %s3531_s25, %s4309_s10 }
  0xb1   :  { %p3537_p12 = pnand %p3535_p11, %p3532_p10 }
  0xb3   :  { %3540 = shalt.err (!%p3537_p12)
}
  0xb4   :  { %s3541_s4 = scalar_lea.vmem %s144_s16, 16  ;;  %s3545_s3 = scalar_lea.vmem %s144_s16, 32 }
  0xb5   :  { %p3542_p13 = scmp.ne.s32.totalorder %s144_s16, %s3541_s4  ;;  %p3546_p0 = scmp.lt.s32.totalorder %s144_s16, %s144_s16 }
  0xb6   :  { %p3547_p1 = scmp.lt.s32.totalorder %s3545_s3, %s3541_s4 }
  0xb8   :  { %p3548_p2 = por %p3547_p1, %p3546_p0 }
  0xba   :  { %p3549_p3 = pnand %p3548_p2, %p3542_p13 }
  0xbc   :  { %3552 = shalt.err (!%p3549_p3)
}
  0xbd   :  { %146 = dma.hbm_to_vmem [thread:$0]  %s4309_s10, 16, %s144_s16, [#allocation17]  }
  0xbe   :  { %s3602_s29 = smov [#allocation19]   ;;  %s3553_s15 = scalar_lea.hbm %s4311_s12, 16 }
  0xbf   :  { %s155_s19 = sshll.u32 %s3602_s29, 4  ;;  %p3554_p4 = scmp.ne.s32.totalorder %s4311_s12, %s3553_s15  ;;  %s156_s19 = int_to_ptr.vmem [resolvable:$true] %s155_s19 }
  0xc0   :  { %p3557_p5 = scmp.lt.u32.totalorder %s3553_s15, %s4311_s12 }
  0xc2   :  { %p3559_p6 = pnand %p3557_p5, %p3554_p4 }
  0xc4   :  { %3562 = shalt.err (!%p3559_p6)
}
  0xc5   :  { %s3563_s7 = scalar_lea.vmem %s156_s19, 16  ;;  %s3567_s10 = scalar_lea.vmem %s156_s19, 32 }
  0xc6   :  { %p3564_p7 = scmp.ne.s32.totalorder %s156_s19, %s3563_s7  ;;  %p3568_p8 = scmp.lt.s32.totalorder %s156_s19, %s156_s19 }
  0xc7   :  { %p3569_p9 = scmp.lt.s32.totalorder %s3567_s10, %s3563_s7 }
  0xc9   :  { %p3570_p10 = por %p3569_p9, %p3568_p8 }
  0xcb   :  { %p3571_p11 = pnand %p3570_p10, %p3564_p7 }
  0xcd   :  { %3574 = shalt.err (!%p3571_p11)
}
  0xce   :  { %158 = dma.hbm_to_vmem [thread:$0]  %s4311_s12, 16, %s156_s19, [#allocation20]  }
  0xcf   :  { %3575 = dma.done.wait [#allocation3], 128  }
  0xd0   :  { %3576 = vsyncadd [#allocation3], 4294967168 }
  0xd1   :  { %3577 = dma.done.wait [#allocation5], 272  }
  0xd2   :  { %3578 = vsyncadd [#allocation5], 4294967024 }
  0xd3   :  { %3579 = dma.done.wait [#allocation8], 1024  }
  0xd4   :  { %3580 = vsyncadd [#allocation8], 4294966272 }
  0xd5   :  { %3581 = dma.done.wait [#allocation11], 32  }
  0xd6   :  { %3582 = vsyncadd [#allocation11], 4294967264 }
  0xd7   :  { %3583 = dma.done.wait [#allocation14], 1024  }
  0xd8   :  { %3584 = vsyncadd [#allocation14], 4294966272 }
  0xd9   :  { %3585 = dma.done.wait [#allocation17], 32  }
  0xda   :  { %3586 = vsyncadd [#allocation17], 4294967264 }
  0xdb   :  { %3587 = dma.done.wait [#allocation20], 16  }
  0xdc   :  { %3588 = vsyncadd [#allocation20], 4294967280  ;;  %v3603_v0 = vmov 0.0|0.0   ;;  %vm3604_vm0 = vmmov 0   ;;  %v3605_v1 = vmov 0.0   ;;  %v210_v2 = vld [vmem:[#allocation4] sm:$0xff] }
  0xdd   :  { %3052 = vmatprep.subr.bf16.mxu0 %v3603_v0  ;;  %2806 = vmatprep.mubr.msk.f32.mxu0 %vm3604_vm0, %v3605_v1  ;;  %v211_v3 = vld [vmem:[#allocation4 + $0x8] sm:$0xff]  ;;  %v199_v5 = vld [vmem:[#allocation9] sm:$0xff]  ;;  %v200_v6 = vld [vmem:[#allocation9 + $0x8] sm:$0xff]  ;;  %vm219_vm1 = vcmask 130048   ;;  %vm307_vm3 = vcmask 261120   ;;  %s3606_s12 = smov 64  }
  0xde   :  { %3055 = vmatprep.subr.bf16.mxu1 %v3603_v0  ;;  %2817 = vmatprep.mubr.msk.f32.mxu1 %vm3604_vm0, %v3605_v1  ;;  %v3053_v4 = vpack.c.bf16 %v211_v3, %v210_v2  ;;  %v296_v7 = vld [vmem:[#allocation7] sm:$0xff]  ;;  %v297_v8 = vld [vmem:[#allocation7 + $0x8] sm:$0xff]  ;;  %v3856_v10 = vpack.c.bf16 %v200_v6, %v199_v5  ;;  %v201_v12 = vld [vmem:[#allocation9 + $0x10] sm:$0xff]  ;;  %s3607_s6 = smov 96   ;;  %s3608_s27 = smov 32  }
  0xdf   :  { %v209_v9 = vld [vmem:[#allocation2] sm:$0xff]  ;;  %v3056_v11 = vpack.c.bf16 %v297_v8, %v296_v7  ;;  %v202_v13 = vld [vmem:[#allocation9 + $0x18] sm:$0xff]  ;;  %v298_v15 = vld [vmem:[#allocation7 + $0x10] sm:$0xff]  ;;  %s4317_s19 = sld [smem:[#allocation28_spill]] }
  0xe0   :  { %3054 = vmatpush3.bf16.msra.mxu0 %v3053_v4  ;;  %v3862_v14 = vpack.c.bf16 %v202_v13, %v201_v12  ;;  %v299_v16 = vld [vmem:[#allocation7 + $0x18] sm:$0xff]  ;;  %v3878_v24 = vld [vmem:[#allocation12] ss:$0 sm:$0xff]  ;;  %v2619_v28 = vld [vmem:[#allocation10] ss:$0 sm:$0xff] }
  0xe1   :  { %3061 = vmatprep.subr.bf16.mxu0 %v3603_v0  ;;  %3057 = vmatpush3.bf16.msra.mxu1 %v3056_v11  ;;  %v3059_v17 = vpack.c.bf16 %v299_v16, %v298_v15  ;;  %v2617_v18 = vld [vmem:[#allocation6] ss:$0 sm:$0xff] }
  0xe2   :  { %3058 = vmatprep.subr.bf16.mxu1 %v3603_v0 }
  0xe3   :  { %2807 = vmatmul.mubr.msk.f32.vlgmr.msra.gmra.mrb[0].mxu0 %vm219_vm1, %v209_v9 }
  0xe4   :  { %3063 = vmatpush3.bf16.msra.mxu0 %v3856_v10  ;;  %2828 = vmatprep.mubr.msk.f32.mxu0 %vm3604_vm0, %v3605_v1 }
  0xe5   :  { %3064 = vmatprep.subr.bf16.mxu0 %v3603_v0  ;;  %3060 = vmatpush3.bf16.msra.mxu1 %v3059_v17 }
  0xe6   :  { %3067 = vmatprep.subr.bf16.mxu1 %v3603_v0 }
  0xe8   :  { %3066 = vmatpush3.bf16.msra.mxu0 %v3862_v14 }
  0xe9   :  { %3073 = vmatprep.subr.bf16.mxu0 %v3603_v0 }
  0xeb   :  { %2829 = vmatmul.mubr.f32.vlgmr.msra.gmra.mrb[2].mxu0 %v3605_v1 }
  0xec   :  { %3075 = vmatpush3.bf16.msra.mxu0 %v3856_v10  ;;  %2850 = vmatprep.mubr.msk.f32.mxu0 %vm3604_vm0, %v3605_v1 }
  0xed   :  { %3076 = vmatprep.subr.bf16.mxu0 %v3603_v0 }
  0xf0   :  { %3078 = vmatpush3.bf16.msra.mxu0 %v3862_v14 }
  0xf1   :  { %3085 = vmatprep.subr.bf16.mxu0 %v3603_v0 }
 0x1b6   :  { %v289_v19 = vpop.f32.mrb[0].mxu0 }
 0x1b7   :  { %v290_v20 = vadd.f32 %v2617_v18, %v289_v19  ;;  %v2808_v21 = vpop.f32.mrb[1].mxu0 }
 0x1b9   :  { %vm293_vm2 = vcmp.gt.f32.partialorder %v290_v20, 0.0  ;;  %v294_v22 = vmul.f32 0.2, %v290_v20 }
 0x1bb   :  { %v295_v23 = vsel %vm293_vm2, %v290_v20, %v294_v22 }
 0x1bc   :  { %2818 = vmatmul.mubr.msk.f32.vlgmr.msra.gmra.mrb[0].mxu1 %vm307_vm3, %v295_v23 }
 0x1bd   :  { %3069 = vmatpush3.bf16.msra.mxu1 %v3856_v10  ;;  %2839 = vmatprep.mubr.msk.f32.mxu1 %vm3604_vm0, %v3605_v1 }
 0x1be   :  { %v456_v25 = vpop.f32.mrb[2].mxu0  ;;  %3070 = vmatprep.subr.bf16.mxu1 %v3603_v0 }
 0x1bf   :  { %v457_v26 = vadd.f32 %v3878_v24, %v456_v25  ;;  %v2830_v27 = vpop.f32.mrb[3].mxu0 }
 0x1c1   :  { %468 = vrot.lane.b32.xlu0 %v457_v26, %s3606_s12  ;;  %3072 = vmatpush3.bf16.msra.mxu1 %v3862_v14 }
 0x1c2   :  { %3079 = vmatprep.subr.bf16.mxu1 %v3603_v0 }
 0x233   :  { %v469_v36 = vpop.permute.xlu0 %468 }
 0x28f   :  { %v377_v29 = vpop.f32.mrb[0].mxu1 }
 0x290   :  { %v3888_v30 = vadd.f32 %v2619_v28, %v377_v29  ;;  %v2819_v31 = vpop.f32.mrb[1].mxu1 }
 0x292   :  { %v460_v32 = vadd.f32 %v457_v26, %v3888_v30 }
 0x294   :  { %v2622_v33 = vmul.f32 -1.442695, %v460_v32 }
 0x296   :  { %3199 = vpow2.f32 %v2622_v33 }
 0x2a0   :  { %v3200_v34 = vpop.eup %3199 }
 0x2a1   :  { %v464_v35 = vadd.f32 1.0, %v3200_v34 }
 0x2a3   :  { %3201 = vrcp.f32 %v464_v35 }
 0x2ad   :  { %v3202_v37 = vpop.eup %3201 }
 0x2ae   :  { %v471_v38 = vmul.f32 %v3202_v37, %v469_v36 }
 0x2b0   :  { %473 = vrot.lane.b32.xlu0 %v471_v38, %s3606_s12 }
 0x322   :  { %v474_v39 = vpop.permute.xlu0 %473 }
 0x323   :  { %v476_v40 = vadd.f32 %v474_v39, %v3888_v30 }
 0x325   :  { %3203 = vtanh.f32 %v476_v40 }
 0x32f   :  { %v3204_v41 = vpop.eup %3203 }
 0x330   :  { %v478_v42 = vsub.f32 0.0, %v3204_v41 }
 0x332   :  { %480 = vrot.lane.b32.xlu1 %v478_v42, %s3607_s6 }
 0x3a4   :  { %v481_v43 = vpop.permute.xlu1 %480 }
 0x3a5   :  { %v483_v44 = vmul.f32 %v3202_v37, %v481_v43 }
 0x3a7   :  { %485 = vrot.lane.b32.xlu1 %v483_v44, %s3608_s27 }
 0x419   :  { %v486_v45 = vpop.permute.xlu1 %485 }
 0x41a   :  { %v488_v46 = vadd.f32 %v3204_v41, %v486_v45 }
 0x41c   :  { %490 = vrot.lane.b32.xlu0 %v488_v46, %s3606_s12 }
 0x48e   :  { %v3896_v47 = vpop.permute.xlu0 %490 }
 0x48f   :  { %2840 = vmatmul.mubr.msk.f32.vlgmr.msra.gmra.mrb[2].mxu1 %vm307_vm3, %v3896_v47 }
 0x490   :  { %3081 = vmatpush3.bf16.msra.mxu1 %v3856_v10  ;;  %2861 = vmatprep.mubr.msk.f32.mxu1 %vm3604_vm0, %v3605_v1 }
 0x491   :  { %3082 = vmatprep.subr.bf16.mxu1 %v3603_v0 }
 0x494   :  { %3084 = vmatpush3.bf16.msra.mxu1 %v3862_v14 }
 0x495   :  { %3091 = vmatprep.subr.bf16.mxu1 %v3603_v0 }
 0x562   :  { %v560_v48 = vpop.f32.mrb[2].mxu1 }
 0x563   :  { %v561_v49 = vadd.f32 %v3878_v24, %v560_v48  ;;  %v2841_v50 = vpop.f32.mrb[3].mxu1 }
 0x565   :  { %572 = vrot.lane.b32.xlu1 %v561_v49, %s3606_s12  ;;  %v564_v51 = vadd.f32 %v561_v49, %v3888_v30 }
 0x567   :  { %v2624_v52 = vmul.f32 -1.442695, %v564_v51 }
 0x569   :  { %3205 = vpow2.f32 %v2624_v52 }
 0x573   :  { %v3206_v53 = vpop.eup %3205 }
 0x574   :  { %v568_v54 = vadd.f32 1.0, %v3206_v53 }
 0x576   :  { %3207 = vrcp.f32 %v568_v54 }
 0x580   :  { %v3208_v55 = vpop.eup %3207 }
 0x5d7   :  { %v573_v56 = vpop.permute.xlu1 %572 }
 0x5d8   :  { %v575_v57 = vmul.f32 %v3208_v55, %v573_v56 }
 0x5da   :  { %577 = vrot.lane.b32.xlu0 %v575_v57, %s3606_s12 }
 0x64c   :  { %v578_v58 = vpop.permute.xlu0 %577 }
 0x64d   :  { %v580_v59 = vadd.f32 %v578_v58, %v3888_v30 }
 0x64f   :  { %3209 = vtanh.f32 %v580_v59 }
 0x659   :  { %v3210_v60 = vpop.eup %3209 }
 0x65a   :  { %v582_v61 = vsub.f32 %v488_v46, %v3210_v60 }
 0x65c   :  { %584 = vrot.lane.b32.xlu1 %v582_v61, %s3607_s6 }
 0x6ce   :  { %v585_v62 = vpop.permute.xlu1 %584 }
 0x6cf   :  { %v587_v63 = vmul.f32 %v3208_v55, %v585_v62 }
 0x6d1   :  { %589 = vrot.lane.b32.xlu0 %v587_v63, %s3608_s27 }
 0x743   :  { %v590_v2 = vpop.permute.xlu0 %589 }
 0x744   :  { %v592_v3 = vadd.f32 %v3210_v60, %v590_v2 }
 0x746   :  { %594 = vrot.lane.b32.xlu1 %v592_v3, %s3606_s12 }
 0x7b8   :  { %v3914_v4 = vpop.permute.xlu1 %594 }
 0x7b9   :  { %2851 = vmatmul.mubr.msk.f32.vlgmr.msra.gmra.mrb[4].mxu0 %vm307_vm3, %v3914_v4 }
 0x7ba   :  { %3087 = vmatpush3.bf16.msra.mxu0 %v3856_v10  ;;  %2872 = vmatprep.mubr.msk.f32.mxu0 %vm3604_vm0, %v3605_v1 }
 0x7bb   :  { %3088 = vmatprep.subr.bf16.mxu0 %v3603_v0 }
 0x7be   :  { %3090 = vmatpush3.bf16.msra.mxu0 %v3862_v14 }
 0x7bf   :  { %3097 = vmatprep.subr.bf16.mxu0 %v3603_v0 }
 0x88c   :  { %v664_v5 = vpop.f32.mrb[4].mxu0 }
 0x88d   :  { %v665_v6 = vadd.f32 %v3878_v24, %v664_v5  ;;  %v2852_v7 = vpop.f32.mrb[5].mxu0 }
 0x88f   :  { %676 = vrot.lane.b32.xlu0 %v665_v6, %s3606_s12  ;;  %v668_v8 = vadd.f32 %v665_v6, %v3888_v30 }
 0x891   :  { %v2626_v9 = vmul.f32 -1.442695, %v668_v8 }
 0x893   :  { %3211 = vpow2.f32 %v2626_v9 }
 0x89d   :  { %v3212_v11 = vpop.eup %3211 }
 0x89e   :  { %v672_v12 = vadd.f32 1.0, %v3212_v11 }
 0x8a0   :  { %3213 = vrcp.f32 %v672_v12 }
 0x8aa   :  { %v3214_v13 = vpop.eup %3213 }
 0x901   :  { %v677_v15 = vpop.permute.xlu0 %676 }
 0x902   :  { %v679_v16 = vmul.f32 %v3214_v13, %v677_v15 }
 0x904   :  { %681 = vrot.lane.b32.xlu1 %v679_v16, %s3606_s12 }
 0x976   :  { %v682_v17 = vpop.permute.xlu1 %681 }
 0x977   :  { %v684_v18 = vadd.f32 %v682_v17, %v3888_v30 }
 0x979   :  { %3215 = vtanh.f32 %v684_v18 }
 0x983   :  { %v3216_v19 = vpop.eup %3215 }
 0x984   :  { %v686_v20 = vsub.f32 %v592_v3, %v3216_v19 }
 0x986   :  { %688 = vrot.lane.b32.xlu0 %v686_v20, %s3607_s6  ;;  %v1217_v20 = vld [vmem:[#allocation13] sm:$0xff] }
 0x9f8   :  { %v689_v21 = vpop.permute.xlu0 %688 }
 0x9f9   :  { %v691_v22 = vmul.f32 %v3214_v13, %v689_v21  ;;  %v1218_v21 = vld [vmem:[#allocation13 + $0x8] sm:$0xff] }
 0x9fb   :  { %693 = vrot.lane.b32.xlu1 %v691_v22, %s3608_s27  ;;  %v3109_v22 = vpack.c.bf16 %v1218_v21, %v1217_v20 }
 0xa6d   :  { %v694_v23 = vpop.permute.xlu1 %693 }
 0xa6e   :  { %v696_v25 = vadd.f32 %v3216_v19, %v694_v23 }
 0xa70   :  { %698 = vrot.lane.b32.xlu0 %v696_v25, %s3606_s12 }
 0xae2   :  { %v3932_v26 = vpop.permute.xlu0 %698 }
 0xae3   :  { %2862 = vmatmul.mubr.msk.f32.vlgmr.msra.gmra.mrb[4].mxu1 %vm307_vm3, %v3932_v26 }
 0xae4   :  { %3093 = vmatpush3.bf16.msra.mxu1 %v3856_v10  ;;  %2883 = vmatprep.mubr.msk.f32.mxu1 %vm3604_vm0, %v3605_v1 }
 0xae5   :  { %3094 = vmatprep.subr.bf16.mxu1 %v3603_v0 }
 0xae8   :  { %3096 = vmatpush3.bf16.msra.mxu1 %v3862_v14 }
 0xae9   :  { %3103 = vmatprep.subr.bf16.mxu1 %v3603_v0 }
 0xbb6   :  { %v768_v27 = vpop.f32.mrb[4].mxu1 }
 0xbb7   :  { %v769_v28 = vadd.f32 %v3878_v24, %v768_v27  ;;  %v2863_v29 = vpop.f32.mrb[5].mxu1 }
 0xbb8   :  { %v1219_v29 = vld [vmem:[#allocation13 + $0x10] sm:$0xff] }
 0xbb9   :  { %780 = vrot.lane.b32.xlu1 %v769_v28, %s3606_s12  ;;  %v772_v31 = vadd.f32 %v769_v28, %v3888_v30 }
 0xbbb   :  { %v2628_v32 = vmul.f32 -1.442695, %v772_v31  ;;  %v1220_v31 = vld [vmem:[#allocation13 + $0x18] sm:$0xff] }
 0xbbd   :  { %3217 = vpow2.f32 %v2628_v32  ;;  %v3113_v32 = vpack.c.bf16 %v1220_v31, %v1219_v29 }
 0xbc7   :  { %v3218_v33 = vpop.eup %3217 }
 0xbc8   :  { %v776_v34 = vadd.f32 1.0, %v3218_v33 }
 0xbca   :  { %3219 = vrcp.f32 %v776_v34 }
 0xbd4   :  { %v3220_v35 = vpop.eup %3219 }
 0xc2b   :  { %v781_v36 = vpop.permute.xlu1 %780 }
 0xc2c   :  { %v783_v37 = vmul.f32 %v3220_v35, %v781_v36 }
 0xc2e   :  { %785 = vrot.lane.b32.xlu0 %v783_v37, %s3606_s12 }
 0xca0   :  { %v786_v38 = vpop.permute.xlu0 %785 }
 0xca1   :  { %v788_v39 = vadd.f32 %v786_v38, %v3888_v30 }
 0xca3   :  { %3221 = vtanh.f32 %v788_v39 }
 0xcad   :  { %v3222_v40 = vpop.eup %3221 }
 0xcae   :  { %v790_v41 = vsub.f32 %v696_v25, %v3222_v40 }
 0xcb0   :  { %792 = vrot.lane.b32.xlu1 %v790_v41, %s3607_s6 }
 0xd22   :  { %v793_v42 = vpop.permute.xlu1 %792 }
 0xd23   :  { %v795_v43 = vmul.f32 %v3220_v35, %v793_v42 }
 0xd25   :  { %797 = vrot.lane.b32.xlu0 %v795_v43, %s3608_s27 }
 0xd97   :  { %v798_v44 = vpop.permute.xlu0 %797 }
 0xd98   :  { %v800_v45 = vadd.f32 %v3222_v40, %v798_v44 }
 0xd9a   :  { %802 = vrot.lane.b32.xlu1 %v800_v45, %s3606_s12 }
 0xe0c   :  { %v3950_v46 = vpop.permute.xlu1 %802 }
 0xe0d   :  { %2873 = vmatmul.mubr.msk.f32.vlgmr.msra.gmra.mrb[6].mxu0 %vm307_vm3, %v3950_v46 }
 0xe0e   :  { %3099 = vmatpush3.bf16.msra.mxu0 %v3856_v10  ;;  %2894 = vmatprep.mubr.msk.f32.mxu0 %vm3604_vm0, %v3605_v1 }
 0xe0f   :  { %3100 = vmatprep.subr.bf16.mxu0 %v3603_v0 }
 0xe12   :  { %3102 = vmatpush3.bf16.msra.mxu0 %v3862_v14 }
 0xe13   :  { %3110 = vmatprep.subr.bf16.mxu0 %v3109_v22 }
 0xee0   :  { %v872_v48 = vpop.f32.mrb[6].mxu0 }
 0xee1   :  { %v873_v49 = vadd.f32 %v3878_v24, %v872_v48  ;;  %v2874_v50 = vpop.f32.mrb[7].mxu0 }
 0xee3   :  { %884 = vrot.lane.b32.xlu0 %v873_v49, %s3606_s12  ;;  %v876_v51 = vadd.f32 %v873_v49, %v3888_v30 }
 0xee5   :  { %v2630_v52 = vmul.f32 -1.442695, %v876_v51 }
 0xee7   :  { %3223 = vpow2.f32 %v2630_v52 }
 0xef1   :  { %v3224_v53 = vpop.eup %3223 }
 0xef2   :  { %v880_v54 = vadd.f32 1.0, %v3224_v53 }
 0xef4   :  { %3225 = vrcp.f32 %v880_v54  ;;  %v204_v54 = vld [vmem:[#allocation15] sm:$0xff] }
 0xefe   :  { %v3226_v55 = vpop.eup %3225 }
 0xf55   :  { %v885_v56 = vpop.permute.xlu0 %884 }
 0xf56   :  { %v887_v57 = vmul.f32 %v3226_v55, %v885_v56 }
 0xf58   :  { %889 = vrot.lane.b32.xlu1 %v887_v57, %s3606_s12  ;;  %v206_v57 = vld [vmem:[#allocation15 + $0x10] sm:$0xff] }
 0xfca   :  { %v890_v58 = vpop.permute.xlu1 %889 }
 0xfcb   :  { %v892_v59 = vadd.f32 %v890_v58, %v3888_v30  ;;  %v207_v58 = vld [vmem:[#allocation15 + $0x18] sm:$0xff] }
 0xfcd   :  { %3227 = vtanh.f32 %v892_v59  ;;  %v4015_v59 = vpack.c.bf16 %v207_v58, %v206_v57 }
 0xfd7   :  { %v3228_v60 = vpop.eup %3227 }
 0xfd8   :  { %v894_v61 = vsub.f32 %v800_v45, %v3228_v60 }
 0xfda   :  { %896 = vrot.lane.b32.xlu0 %v894_v61, %s3607_s6 }
0x104c   :  { %v897_v62 = vpop.permute.xlu0 %896 }
0x104d   :  { %v899_v63 = vmul.f32 %v3226_v55, %v897_v62  ;;  %v205_v55 = vld [vmem:[#allocation15 + $0x8] sm:$0xff] }
0x104e   :  { %v4011_v56 = vpack.c.bf16 %v205_v55, %v204_v54 }
0x104f   :  { %901 = vrot.lane.b32.xlu1 %v899_v63, %s3608_s27 }
0x10c1   :  { %v902_v2 = vpop.permute.xlu1 %901 }
0x10c2   :  { %v904_v3 = vadd.f32 %v3228_v60, %v902_v2 }
0x10c4   :  { %906 = vrot.lane.b32.xlu0 %v904_v3, %s3606_s12 }
0x1136   :  { %v907_v5 = vpop.permute.xlu0 %906 }
0x1137   :  { %2884 = vmatmul.mubr.msk.f32.vlgmr.msra.gmra.mrb[6].mxu1 %vm307_vm3, %v907_v5 }
0x1138   :  { %3105 = vmatpush3.bf16.msra.mxu1 %v3856_v10  ;;  %2905 = vmatprep.mubr.msk.f32.mxu1 %vm3604_vm0, %v3605_v1 }
0x1139   :  { %3106 = vmatprep.subr.bf16.mxu1 %v3603_v0 }
0x113c   :  { %3108 = vmatpush3.bf16.msra.mxu1 %v3862_v14 }
0x113d   :  { %3117 = vmatprep.subr.bf16.mxu1 %v3603_v0 }
0x120a   :  { %v976_v6 = vpop.f32.mrb[6].mxu1 }
0x120b   :  { %v977_v7 = vadd.f32 %v3878_v24, %v976_v6  ;;  %v2885_v8 = vpop.f32.mrb[7].mxu1 }
0x120c   :  { %v4042_v8 = vld [vmem:[#allocation16] ss:$0 sm:$0xff] }
0x120d   :  { %988 = vrot.lane.b32.xlu1 %v977_v7, %s3606_s12  ;;  %v980_v9 = vadd.f32 %v977_v7, %v3888_v30 }
0x120f   :  { %v2632_v11 = vmul.f32 -1.442695, %v980_v9 }
0x1211   :  { %3229 = vpow2.f32 %v2632_v11 }
0x121b   :  { %v3230_v10 = vpop.eup %3229 }
0x121c   :  { %v984_v12 = vadd.f32 1.0, %v3230_v10 }
0x121e   :  { %3231 = vrcp.f32 %v984_v12 }
0x1228   :  { %v3232_v13 = vpop.eup %3231 }
0x127f   :  { %v989_v15 = vpop.permute.xlu1 %988 }
0x1280   :  { %v991_v16 = vmul.f32 %v3232_v13, %v989_v15 }
0x1282   :  { %993 = vrot.lane.b32.xlu0 %v991_v16, %s3606_s12 }
0x12f4   :  { %v994_v14 = vpop.permute.xlu0 %993 }
0x12f5   :  { %v996_v17 = vadd.f32 %v994_v14, %v3888_v30 }
0x12f7   :  { %3233 = vtanh.f32 %v996_v17 }
0x1301   :  { %v3234_v18 = vpop.eup %3233 }
0x1302   :  { %v998_v19 = vsub.f32 %v904_v3, %v3234_v18  ;;  %v4038_v3 = vld [vmem:[#allocation18] ss:$0 sm:$0xff] }
0x1304   :  { %1000 = vrot.lane.b32.xlu1 %v998_v19, %s3607_s6 }
0x1376   :  { %v1001_v23 = vpop.permute.xlu1 %1000 }
0x1377   :  { %v1003_v25 = vmul.f32 %v3232_v13, %v1001_v23 }
0x1379   :  { %1005 = vrot.lane.b32.xlu0 %v1003_v25, %s3608_s27 }
0x13eb   :  { %v1006_v27 = vpop.permute.xlu0 %1005 }
0x13ec   :  { %v1008_v28 = vadd.f32 %v3234_v18, %v1006_v27 }
0x13ee   :  { %1010 = vrot.lane.b32.xlu1 %v1008_v28, %s3606_s12 }
0x1460   :  { %v1011_v33 = vpop.permute.xlu1 %1010 }
0x1461   :  { %2895 = vmatmul.mubr.msk.f32.vlgmr.msra.gmra.mrb[8].mxu0 %vm307_vm3, %v1011_v33 }
0x1462   :  { %3112 = vmatpush3.bf16.msra.mxu0 %v3109_v22  ;;  %2916 = vmatprep.mubr.msk.f32.mxu0 %vm307_vm3, %v3896_v47 }
0x1463   :  { %3114 = vmatprep.subr.bf16.mxu0 %v3113_v32 }
0x1466   :  { %3116 = vmatpush3.bf16.msra.mxu0 %v3113_v32 }
0x1467   :  { %3129 = vmatprep.subr.bf16.mxu0 %v3603_v0 }
0x1469   :  { %2917 = vmatmul.mubr.msk.f32.vlgmr.msra.gmra.mrb[10].mxu0 %vm307_vm3, %v3914_v4 }
0x146a   :  { %2919 = vmatprep.mubr.msk.f32.mxu0 %vm307_vm3, %v3932_v26  ;;  %3131 = vmatpush3.bf16.msra.mxu0 %v4011_v56 }
0x146b   :  { %3132 = vmatprep.subr.bf16.mxu0 %v3603_v0 }
0x146d   :  { %2920 = vmatmul.mubr.msk.f32.gmra.mrb[12].mxu0 %vm307_vm3, %v3950_v46 }
0x146e   :  { %2922 = vmatprep.mubr.msk.f32.mxu0 %vm307_vm3, %v907_v5  ;;  %3134 = vmatpush3.bf16.msra.mxu0 %v4015_v59 }
0x146f   :  { %3141 = vmatprep.subr.bf16.mxu0 %v3603_v0 }
0x1471   :  { %2923 = vmatmul.mubr.msk.f32.gmra.mrb[14].mxu0 %vm307_vm3, %v1011_v33 }
0x1534   :  { %v1080_v34 = vpop.f32.mrb[8].mxu0 }
0x1535   :  { %v1081_v47 = vadd.f32 %v3878_v24, %v1080_v34  ;;  %v2896_v35 = vpop.f32.mrb[9].mxu0 }
0x1537   :  { %1092 = vrot.lane.b32.xlu0 %v1081_v47, %s3606_s12  ;;  %v1084_v40 = vadd.f32 %v1081_v47, %v3888_v30 }
0x1539   :  { %v2634_v41 = vmul.f32 -1.442695, %v1084_v40 }
0x153b   :  { %3235 = vpow2.f32 %v2634_v41 }
0x153c   :  { %v3996_v36 = vpop.f32.mrb[10].mxu0 }
0x153d   :  { %v1299_v37 = vpop.f32.mrb[11].mxu0 }
0x153e   :  { %v1300_v9 = vadd.f32 %v4042_v8, %v1299_v37 }
0x1540   :  { %v3998_v4 = vpop.f32.mrb[12].mxu0 }
0x1541   :  { %v4000_v38 = vpop.f32.mrb[13].mxu0 }
0x1544   :  { %v4002_v26 = vpop.f32.mrb[14].mxu0 }
0x1545   :  { %v4004_v39 = vpop.f32.mrb[15].mxu0  ;;  %v3236_v42 = vpop.eup %3235 }
0x1546   :  { %v1088_v43 = vadd.f32 1.0, %v3236_v42 }
0x1548   :  { %3237 = vrcp.f32 %v1088_v43 }
0x1552   :  { %v3238_v44 = vpop.eup %3237 }
0x15a9   :  { %v1093_v45 = vpop.permute.xlu0 %1092 }
0x15aa   :  { %v1095_v46 = vmul.f32 %v3238_v44, %v1093_v45 }
0x15ac   :  { %1097 = vrot.lane.b32.xlu1 %v1095_v46, %s3606_s12 }
0x161e   :  { %v1098_v48 = vpop.permute.xlu1 %1097 }
0x161f   :  { %v1100_v49 = vadd.f32 %v1098_v48, %v3888_v30 }
0x1621   :  { %3239 = vtanh.f32 %v1100_v49  ;;  %v1305_v49 = vadd.f32 %v3996_v36, %v4042_v8 }
0x162b   :  { %v3240_v50 = vpop.eup %3239 }
0x162c   :  { %v1102_v51 = vsub.f32 %v1008_v28, %v3240_v50 }
0x162e   :  { %1104 = vrot.lane.b32.xlu0 %v1102_v51, %s3607_s6 }
0x16a0   :  { %v1105_v52 = vpop.permute.xlu0 %1104 }
0x16a1   :  { %v1107_v53 = vmul.f32 %v3238_v44, %v1105_v52 }
0x16a3   :  { %1109 = vrot.lane.b32.xlu1 %v1107_v53, %s3608_s27 }
0x1715   :  { %v1110_v60 = vpop.permute.xlu1 %1109 }
0x1716   :  { %v4019_v61 = vadd.f32 %v3240_v50, %v1110_v60 }
0x1718   :  { %1114 = vrot.lane.b32.xlu0 %v4019_v61, %s3606_s12 }
0x178a   :  { %v1115_v62 = vpop.permute.xlu0 %1114 }
0x178b   :  { %2906 = vmatmul.mubr.msk.f32.vlgmr.msra.gmra.mrb[8].mxu1 %vm307_vm3, %v1115_v62  ;;  %2925 = vmatprep.mubr.msk.f32.mxu0 %vm307_vm3, %v1115_v62 }
0x178c   :  { %3119 = vmatpush3.bf16.msra.mxu1 %v4011_v56  ;;  %2936 = vmatprep.mubr.msk.f32.mxu1 %vm3604_vm0, %v3605_v1 }
0x178d   :  { %3120 = vmatprep.subr.bf16.mxu1 %v3603_v0 }
0x1790   :  { %3122 = vmatpush3.bf16.msra.mxu1 %v4015_v59 }
0x1791   :  { %3123 = vmatprep.subr.bf16.mxu1 %v3603_v0 }
0x1793   :  { %2937 = vmatmul.mubr.f32.vlgmr.msra.gmra.mrb[10].mxu1 %v3605_v1 }
0x1794   :  { %3125 = vmatpush3.bf16.msra.mxu1 %v4011_v56  ;;  %2947 = vmatprep.mubr.msk.f32.mxu1 %vm3604_vm0, %v3605_v1 }
0x1795   :  { %3126 = vmatprep.subr.bf16.mxu1 %v3603_v0 }
0x1798   :  { %3128 = vmatpush3.bf16.msra.mxu1 %v4015_v59 }
0x1799   :  { %3135 = vmatprep.subr.bf16.mxu1 %v3603_v0 }
0x185e   :  { %v1184_v63 = vpop.f32.mrb[8].mxu1 }
0x185f   :  { %v2907_v2 = vpop.f32.mrb[9].mxu1  ;;  %v1185_v23 = vadd.f32 %v3878_v24, %v1184_v63 }
0x1861   :  { %v1188_v25 = vadd.f32 %v1185_v23, %v3888_v30 }
0x1863   :  { %v2636_v27 = vmul.f32 -1.442695, %v1188_v25 }
0x1866   :  { %v1410_v5 = vpop.f32.mrb[10].mxu1 }
0x1867   :  { %v1411_v6 = vadd.f32 %v4038_v3, %v1410_v5  ;;  %v2938_v7 = vpop.f32.mrb[11].mxu1 }
0x1869   :  { %1422 = vrot.lane.b32.xlu1 %v1411_v6, %s3606_s12  ;;  %v1414_v11 = vadd.f32 %v1411_v6, %v1300_v9 }
0x186b   :  { %v2647_v10 = vmul.f32 -1.442695, %v1414_v11 }
0x186d   :  { %3241 = vpow2.f32 %v2647_v10 }
0x1877   :  { %v3242_v12 = vpop.eup %3241 }
0x1878   :  { %v1418_v13 = vadd.f32 1.0, %v3242_v12 }
0x187a   :  { %3243 = vrcp.f32 %v1418_v13 }
0x1884   :  { %v3244_v15 = vpop.eup %3243 }
0x18db   :  { %v1423_v16 = vpop.permute.xlu1 %1422 }
0x18dc   :  { %v1425_v14 = vmul.f32 %v3244_v15, %v1423_v16 }
0x18de   :  { %1427 = vrot.lane.b32.xlu0 %v1425_v14, %s3606_s12 }
0x1950   :  { %v1428_v17 = vpop.permute.xlu0 %1427 }
0x1951   :  { %v1430_v18 = vadd.f32 %v1428_v17, %v1300_v9 }
0x1953   :  { %3245 = vtanh.f32 %v1430_v18 }
0x1954   :  { %3247 = vpow2.f32 %v2636_v27 }
0x195d   :  { %v3246_v19 = vpop.eup %3245 }
0x195e   :  { %v1432_v20 = vsub.f32 0.0, %v3246_v19  ;;  %v3248_v28 = vpop.eup %3247 }
0x195f   :  { %v1192_v29 = vadd.f32 1.0, %v3248_v28 }
0x1960   :  { %1434 = vrot.lane.b32.xlu1 %v1432_v20, %s3607_s6 }
0x1961   :  { %3249 = vrcp.f32 %v1192_v29 }
0x196b   :  { %v3250_v33 = vpop.eup %3249 }
0x19d2   :  { %v1435_v21 = vpop.permute.xlu1 %1434 }
0x19d3   :  { %v1437_v22 = vmul.f32 %v3244_v15, %v1435_v21  ;;  %v1310_v15 = vadd.f32 %v4042_v8, %v4000_v38 }
0x19d5   :  { %1439 = vrot.lane.b32.xlu0 %v1437_v22, %s3608_s27 }
0x19d9   :  { %1196 = vrot.lane.b32.xlu0 %v1185_v23, %s3606_s12 }
0x1a47   :  { %v1440_v31 = vpop.permute.xlu0 %1439 }
0x1a48   :  { %v1442_v32 = vadd.f32 %v3246_v19, %v1440_v31 }
0x1a4a   :  { %1444 = vrot.lane.b32.xlu1 %v1442_v32, %s3606_s12 }
0x1a4b   :  { %v1197_v34 = vpop.permute.xlu0 %1196 }
0x1a4c   :  { %v1199_v47 = vmul.f32 %v3250_v33, %v1197_v34 }
0x1a4e   :  { %1201 = vrot.lane.b32.xlu0 %v1199_v47, %s3606_s12 }
0x1abc   :  { %v4053_v35 = vpop.permute.xlu1 %1444 }
0x1abd   :  { %2948 = vmatmul.mubr.msk.f32.vlgmr.msra.gmra.mrb[12].mxu1 %vm307_vm3, %v4053_v35 }
0x1abe   :  { %3137 = vmatpush3.bf16.msra.mxu1 %v4011_v56  ;;  %2969 = vmatprep.mubr.msk.f32.mxu1 %vm3604_vm0, %v3605_v1 }
0x1abf   :  { %3138 = vmatprep.subr.bf16.mxu1 %v3603_v0 }
0x1ac0   :  { %v1202_v24 = vpop.permute.xlu0 %1201 }
0x1ac1   :  { %v1204_v37 = vadd.f32 %v1202_v24, %v3888_v30  ;;  %v1315_v24 = vadd.f32 %v3998_v4, %v4042_v8 }
0x1ac2   :  { %3140 = vmatpush3.bf16.msra.mxu1 %v4015_v59 }
0x1ac3   :  { %3251 = vtanh.f32 %v1204_v37  ;;  %3147 = vmatprep.subr.bf16.mxu1 %v3603_v0 }
0x1acd   :  { %v3252_v40 = vpop.eup %3251 }
0x1ace   :  { %v1206_v41 = vsub.f32 %v4019_v61, %v3252_v40 }
0x1ad0   :  { %1208 = vrot.lane.b32.xlu0 %v1206_v41, %s3607_s6 }
0x1b42   :  { %v1209_v42 = vpop.permute.xlu0 %1208 }
0x1b43   :  { %v1211_v43 = vmul.f32 %v3250_v33, %v1209_v42 }
0x1b45   :  { %1213 = vrot.lane.b32.xlu0 %v1211_v43, %s3608_s27 }
0x1b90   :  { %v1514_v44 = vpop.f32.mrb[12].mxu1 }
0x1b91   :  { %v1515_v45 = vadd.f32 %v4038_v3, %v1514_v44  ;;  %v2949_v46 = vpop.f32.mrb[13].mxu1 }
0x1b93   :  { %1526 = vrot.lane.b32.xlu1 %v1515_v45, %s3606_s12  ;;  %v1518_v50 = vadd.f32 %v1515_v45, %v1305_v49 }
0x1b95   :  { %v2649_v51 = vmul.f32 -1.442695, %v1518_v50 }
0x1b97   :  { %3253 = vpow2.f32 %v2649_v51 }
0x1ba1   :  { %v3254_v52 = vpop.eup %3253 }
0x1ba2   :  { %v1522_v53 = vadd.f32 1.0, %v3254_v52 }
0x1ba4   :  { %3255 = vrcp.f32 %v1522_v53 }
0x1bae   :  { %v3256_v54 = vpop.eup %3255 }
0x1bb7   :  { %v1214_v30 = vpop.permute.xlu0 %1213 }
0x1bb8   :  { %v1216_v48 = vadd.f32 %v3252_v40, %v1214_v30 }
0x1bba   :  { %1229 = vrot.lane.b32.xlu0 %v1216_v48, %s3606_s12 }
0x1c05   :  { %v1527_v55 = vpop.permute.xlu1 %1526 }
0x1c06   :  { %v1529_v57 = vmul.f32 %v3256_v54, %v1527_v55 }
0x1c08   :  { %1531 = vrot.lane.b32.xlu1 %v1529_v57, %s3606_s12 }
0x1c2c   :  { %v1230_v58 = vpop.permute.xlu0 %1229 }
0x1c2d   :  { %2926 = vmatmul.mubr.msk.f32.gmra.mrb[16].mxu0 %vm307_vm3, %v1230_v58  ;;  %v1320_v58 = vadd.f32 %v4042_v8, %v4004_v39 }
0x1c2e   :  { %2958 = vmatprep.mubr.msk.f32.mxu0 %vm3604_vm0, %v3605_v1 }
0x1c7a   :  { %v1532_v60 = vpop.permute.xlu1 %1531 }
0x1c7b   :  { %v1534_v61 = vadd.f32 %v1532_v60, %v1305_v49 }
0x1c7d   :  { %3257 = vtanh.f32 %v1534_v61 }
0x1c87   :  { %v3258_v36 = vpop.eup %3257 }
0x1c88   :  { %v1536_v62 = vsub.f32 %v1442_v32, %v3258_v36 }
0x1c8a   :  { %1538 = vrot.lane.b32.xlu1 %v1536_v62, %s3607_s6 }
0x1cfc   :  { %v1539_v63 = vpop.permute.xlu1 %1538 }
0x1cfd   :  { %v1541_v2 = vmul.f32 %v3256_v54, %v1539_v63 }
0x1cff   :  { %1543 = vrot.lane.b32.xlu1 %v1541_v2, %s3608_s27 }
0x1d00   :  { %v4078_v5 = vpop.f32.mrb[16].mxu0 }
0x1d01   :  { %v4080_v6 = vpop.f32.mrb[17].mxu0 }
0x1d71   :  { %v1544_v7 = vpop.permute.xlu1 %1543 }
0x1d72   :  { %v1546_v9 = vadd.f32 %v3258_v36, %v1544_v7 }
0x1d74   :  { %1548 = vrot.lane.b32.xlu1 %v1546_v9, %s3606_s12 }
0x1de6   :  { %v4083_v11 = vpop.permute.xlu1 %1548 }
0x1de7   :  { %2959 = vmatmul.mubr.msk.f32.vlgmr.msra.gmra.mrb[18].mxu0 %vm307_vm3, %v4083_v11 }
0x1de8   :  { %3143 = vmatpush3.bf16.msra.mxu0 %v4011_v56  ;;  %2980 = vmatprep.mubr.msk.f32.mxu0 %vm3604_vm0, %v3605_v1 }
0x1de9   :  { %3144 = vmatprep.subr.bf16.mxu0 %v3603_v0 }
0x1dec   :  { %3146 = vmatpush3.bf16.msra.mxu0 %v4015_v59 }
0x1ded   :  { %3153 = vmatprep.subr.bf16.mxu0 %v3603_v0 }
0x1eba   :  { %v1618_v10 = vpop.f32.mrb[18].mxu0 }
0x1ebb   :  { %v1619_v12 = vadd.f32 %v4038_v3, %v1618_v10  ;;  %v2960_v13 = vpop.f32.mrb[19].mxu0 }
0x1ebd   :  { %1630 = vrot.lane.b32.xlu0 %v1619_v12, %s3606_s12  ;;  %v1622_v16 = vadd.f32 %v1619_v12, %v1310_v15 }
0x1ebf   :  { %v2651_v14 = vmul.f32 -1.442695, %v1622_v16 }
0x1ec1   :  { %3259 = vpow2.f32 %v2651_v14 }
0x1ecb   :  { %v3260_v17 = vpop.eup %3259 }
0x1ecc   :  { %v1626_v18 = vadd.f32 1.0, %v3260_v17 }
0x1ece   :  { %3261 = vrcp.f32 %v1626_v18 }
0x1ed8   :  { %v3262_v19 = vpop.eup %3261 }
0x1f2f   :  { %v1631_v20 = vpop.permute.xlu0 %1630 }
0x1f30   :  { %v1633_v21 = vmul.f32 %v3262_v19, %v1631_v20 }
0x1f32   :  { %1635 = vrot.lane.b32.xlu1 %v1633_v21, %s3606_s12  ;;  %v1325_v21 = vadd.f32 %v4002_v26, %v4042_v8  ;;  %v2171_v26 = vld [vmem:[%s4310_s11] sm:$0xff] }
0x1fa4   :  { %v1636_v22 = vpop.permute.xlu1 %1635 }
0x1fa5   :  { %v1638_v23 = vadd.f32 %v1636_v22, %v1310_v15 }
0x1fa7   :  { %3263 = vtanh.f32 %v1638_v23 }
0x1fb1   :  { %v3264_v25 = vpop.eup %3263 }
0x1fb2   :  { %v1640_v27 = vsub.f32 %v1546_v9, %v3264_v25 }
0x1fb4   :  { %1642 = vrot.lane.b32.xlu0 %v1640_v27, %s3607_s6 }
0x2026   :  { %v1643_v28 = vpop.permute.xlu0 %1642 }
0x2027   :  { %v1645_v38 = vmul.f32 %v3262_v19, %v1643_v28 }
0x2029   :  { %1647 = vrot.lane.b32.xlu1 %v1645_v38, %s3608_s27 }
0x209b   :  { %v1648_v29 = vpop.permute.xlu1 %1647 }
0x209c   :  { %v1650_v31 = vadd.f32 %v3264_v25, %v1648_v29 }
0x209e   :  { %1652 = vrot.lane.b32.xlu0 %v1650_v31, %s3606_s12 }
0x2110   :  { %v4101_v32 = vpop.permute.xlu0 %1652 }
0x2111   :  { %2970 = vmatmul.mubr.msk.f32.vlgmr.msra.gmra.mrb[14].mxu1 %vm307_vm3, %v4101_v32 }
0x2112   :  { %3149 = vmatpush3.bf16.msra.mxu1 %v4011_v56  ;;  %2991 = vmatprep.mubr.msk.f32.mxu1 %vm3604_vm0, %v3605_v1 }
0x2113   :  { %3150 = vmatprep.subr.bf16.mxu1 %v3603_v0 }
0x2116   :  { %3152 = vmatpush3.bf16.msra.mxu1 %v4015_v59 }
0x2117   :  { %3159 = vmatprep.subr.bf16.mxu1 %v3603_v0 }
0x21e4   :  { %v1722_v33 = vpop.f32.mrb[14].mxu1 }
0x21e5   :  { %v1723_v34 = vadd.f32 %v4038_v3, %v1722_v33  ;;  %v2971_v47 = vpop.f32.mrb[15].mxu1 }
0x21e7   :  { %1734 = vrot.lane.b32.xlu1 %v1723_v34, %s3606_s12  ;;  %v1726_v37 = vadd.f32 %v1723_v34, %v1315_v24 }
0x21e9   :  { %v2653_v40 = vmul.f32 -1.442695, %v1726_v37 }
0x21eb   :  { %3265 = vpow2.f32 %v2653_v40  ;;  %v2173_v40 = vld [vmem:[%s4310_s11 + $0x10] sm:$0xff] }
0x21f5   :  { %v3266_v41 = vpop.eup %3265 }
0x21f6   :  { %v1730_v42 = vadd.f32 1.0, %v3266_v41  ;;  %v2174_v41 = vld [vmem:[%s4310_s11 + $0x18] sm:$0xff] }
0x21f8   :  { %3267 = vrcp.f32 %v1730_v42  ;;  %v3169_v42 = vpack.c.bf16 %v2174_v41, %v2173_v40 }
0x2202   :  { %v3268_v43 = vpop.eup %3267 }
0x2259   :  { %v1735_v44 = vpop.permute.xlu1 %1734 }
0x225a   :  { %v1737_v45 = vmul.f32 %v3268_v43, %v1735_v44 }
0x225c   :  { %1739 = vrot.lane.b32.xlu0 %v1737_v45, %s3606_s12 }
0x22ce   :  { %v1740_v46 = vpop.permute.xlu0 %1739 }
0x22cf   :  { %v1742_v30 = vadd.f32 %v1740_v46, %v1315_v24 }
0x22d1   :  { %3269 = vtanh.f32 %v1742_v30 }
0x22db   :  { %v3270_v48 = vpop.eup %3269 }
0x22dc   :  { %v1744_v49 = vsub.f32 %v1650_v31, %v3270_v48  ;;  %v2172_v31 = vld [vmem:[%s4310_s11 + $0x8] sm:$0xff] }
0x22dd   :  { %v3165_v33 = vpack.c.bf16 %v2172_v31, %v2171_v26  ;;  %v4210_v31 = vld [vmem:[%s4313_s14] ss:$0 sm:$0xff] }
0x22de   :  { %1746 = vrot.lane.b32.xlu1 %v1744_v49, %s3607_s6 }
0x2350   :  { %v1747_v50 = vpop.permute.xlu1 %1746 }
0x2351   :  { %v1749_v4 = vmul.f32 %v3268_v43, %v1747_v50 }
0x2353   :  { %1751 = vrot.lane.b32.xlu0 %v1749_v4, %s3608_s27 }
0x23c5   :  { %v1752_v51 = vpop.permute.xlu0 %1751 }
0x23c6   :  { %v1754_v52 = vadd.f32 %v3270_v48, %v1752_v51 }
0x23c8   :  { %1756 = vrot.lane.b32.xlu1 %v1754_v52, %s3606_s12 }
0x243a   :  { %v4119_v53 = vpop.permute.xlu1 %1756 }
0x243b   :  { %2981 = vmatmul.mubr.msk.f32.vlgmr.msra.gmra.mrb[20].mxu0 %vm307_vm3, %v4119_v53 }
0x243c   :  { %3155 = vmatpush3.bf16.msra.mxu0 %v4011_v56  ;;  %3002 = vmatprep.mubr.msk.f32.mxu0 %vm3604_vm0, %v3605_v1 }
0x243d   :  { %3156 = vmatprep.subr.bf16.mxu0 %v3603_v0 }
0x2440   :  { %3158 = vmatpush3.bf16.msra.mxu0 %v4015_v59 }
0x2441   :  { %3166 = vmatprep.subr.bf16.mxu0 %v3165_v33 }
0x250e   :  { %v1826_v54 = vpop.f32.mrb[20].mxu0 }
0x250f   :  { %v1827_v55 = vadd.f32 %v4038_v3, %v1826_v54  ;;  %v2982_v57 = vpop.f32.mrb[21].mxu0 }
0x2511   :  { %1838 = vrot.lane.b32.xlu0 %v1827_v55, %s3606_s12  ;;  %v1830_v60 = vadd.f32 %v1827_v55, %v1320_v58 }
0x2513   :  { %v2655_v61 = vmul.f32 -1.442695, %v1830_v60 }
0x2515   :  { %3271 = vpow2.f32 %v2655_v61 }
0x251f   :  { %v3272_v36 = vpop.eup %3271 }
0x2520   :  { %v1834_v62 = vadd.f32 1.0, %v3272_v36 }
0x2522   :  { %3273 = vrcp.f32 %v1834_v62 }
0x252c   :  { %v3274_v63 = vpop.eup %3273 }
0x2583   :  { %v1839_v2 = vpop.permute.xlu0 %1838 }
0x2584   :  { %v1841_v7 = vmul.f32 %v3274_v63, %v1839_v2  ;;  %v2317_v2 = vld [vmem:[%s4312_s13 + $0x8] sm:$0xff] }
0x2586   :  { %1843 = vrot.lane.b32.xlu1 %v1841_v7, %s3606_s12 }
0x25f8   :  { %v1844_v9 = vpop.permute.xlu1 %1843 }
0x25f9   :  { %v1846_v10 = vadd.f32 %v1844_v9, %v1320_v58 }
0x25fb   :  { %3275 = vtanh.f32 %v1846_v10 }
0x2605   :  { %v3276_v12 = vpop.eup %3275 }
0x2606   :  { %v1848_v13 = vsub.f32 %v1754_v52, %v3276_v12 }
0x2608   :  { %1850 = vrot.lane.b32.xlu0 %v1848_v13, %s3607_s6 }
0x267a   :  { %v1851_v15 = vpop.permute.xlu0 %1850 }
0x267b   :  { %v1853_v39 = vmul.f32 %v3274_v63, %v1851_v15  ;;  %v2316_v63 = vld [vmem:[%s4312_s13] sm:$0xff] }
0x267c   :  { %v3173_v7 = vpack.c.bf16 %v2317_v2, %v2316_v63 }
0x267d   :  { %1855 = vrot.lane.b32.xlu1 %v1853_v39, %s3608_s27 }
0x26ef   :  { %v1856_v16 = vpop.permute.xlu1 %1855 }
0x26f0   :  { %v1858_v14 = vadd.f32 %v3276_v12, %v1856_v16  ;;  %v4190_v12 = vld [vmem:[#allocation19] ss:$0 sm:$0xff] }
0x26f2   :  { %1860 = vrot.lane.b32.xlu0 %v1858_v14, %s3606_s12 }
0x2764   :  { %v1861_v17 = vpop.permute.xlu0 %1860 }
0x2765   :  { %2992 = vmatmul.mubr.msk.f32.vlgmr.msra.gmra.mrb[16].mxu1 %vm307_vm3, %v1861_v17 }
0x2766   :  { %3161 = vmatpush3.bf16.msra.mxu1 %v4011_v56  ;;  %3013 = vmatprep.mubr.msk.f32.mxu1 %vm3604_vm0, %v3605_v1 }
0x2767   :  { %3162 = vmatprep.subr.bf16.mxu1 %v3603_v0 }
0x276a   :  { %3164 = vmatpush3.bf16.msra.mxu1 %v4015_v59 }
0x276b   :  { %3174 = vmatprep.subr.bf16.mxu1 %v3173_v7 }
0x2838   :  { %v1930_v18 = vpop.f32.mrb[16].mxu1 }
0x2839   :  { %v1931_v19 = vadd.f32 %v4038_v3, %v1930_v18  ;;  %v2993_v20 = vpop.f32.mrb[17].mxu1 }
0x283b   :  { %1942 = vrot.lane.b32.xlu1 %v1931_v19, %s3606_s12  ;;  %v1934_v22 = vadd.f32 %v1931_v19, %v1325_v21 }
0x283d   :  { %v2657_v23 = vmul.f32 -1.442695, %v1934_v22 }
0x283f   :  { %3277 = vpow2.f32 %v2657_v23 }
0x2849   :  { %v3278_v56 = vpop.eup %3277 }
0x284a   :  { %v1938_v25 = vadd.f32 1.0, %v3278_v56 }
0x284c   :  { %3279 = vrcp.f32 %v1938_v25 }
0x2856   :  { %v3280_v1 = vpop.eup %3279 }
0x28ad   :  { %v1943_v27 = vpop.permute.xlu1 %1942 }
0x28ae   :  { %v1945_v0 = vmul.f32 %v3280_v1, %v1943_v27 }
0x28b0   :  { %1947 = vrot.lane.b32.xlu0 %v1945_v0, %s3606_s12 }
0x2922   :  { %v1948_v59 = vpop.permute.xlu0 %1947 }
0x2923   :  { %v1950_v28 = vadd.f32 %v1948_v59, %v1325_v21 }
0x2925   :  { %3281 = vtanh.f32 %v1950_v28 }
0x292f   :  { %v3282_v38 = vpop.eup %3281 }
0x2930   :  { %v1952_v29 = vsub.f32 %v1858_v14, %v3282_v38 }
0x2932   :  { %1954 = vrot.lane.b32.xlu1 %v1952_v29, %s3607_s6 }
0x29a4   :  { %v1955_v34 = vpop.permute.xlu1 %1954 }
0x29a5   :  { %v1957_v47 = vmul.f32 %v3280_v1, %v1955_v34 }
0x29a7   :  { %1959 = vrot.lane.b32.xlu0 %v1957_v47, %s3608_s27 }
0x2a19   :  { %v1960_v24 = vpop.permute.xlu0 %1959 }
0x2a1a   :  { %v1962_v37 = vadd.f32 %v3282_v38, %v1960_v24 }
0x2a1c   :  { %1964 = vrot.lane.b32.xlu1 %v1962_v37, %s3606_s12 }
0x2a8e   :  { %v1965_v43 = vpop.permute.xlu1 %1964 }
0x2a8f   :  { %3003 = vmatmul.mubr.msk.f32.vlgmr.msra.gmra.mrb[22].mxu0 %vm307_vm3, %v1965_v43 }
0x2a90   :  { %3168 = vmatpush3.bf16.msra.mxu0 %v3165_v33  ;;  %3024 = vmatprep.mubr.msk.f32.mxu0 %vm307_vm3, %v4053_v35 }
0x2a91   :  { %3170 = vmatprep.subr.bf16.mxu0 %v3169_v42 }
0x2a94   :  { %3172 = vmatpush3.bf16.msra.mxu0 %v3169_v42  ;;  %v3609_v42 = vmov 1983009808  }
0x2a97   :  { %3025 = vmatmul.mubr.msk.f32.vlgmr.msra.gmra.mrb[24].mxu0 %vm307_vm3, %v4083_v11 }
0x2a98   :  { %3027 = vmatprep.mubr.msk.f32.mxu0 %vm307_vm3, %v4101_v32  ;;  %v1330_v32 = vadd.f32 %v4042_v8, %v4080_v6 }
0x2a9b   :  { %3028 = vmatmul.mubr.msk.f32.gmra.mrb[26].mxu0 %vm307_vm3, %v4119_v53 }
0x2a9c   :  { %3030 = vmatprep.mubr.msk.f32.mxu0 %vm307_vm3, %v1861_v17 }
0x2a9f   :  { %3031 = vmatmul.mubr.msk.f32.gmra.mrb[28].mxu0 %vm307_vm3, %v1965_v43  ;;  %v2465_v43 = vunpack.c.l.s4 %v3609_v42 }
0x2b62   :  { %v2034_v44 = vpop.f32.mrb[22].mxu0 }
0x2b63   :  { %v2035_v45 = vadd.f32 %v4038_v3, %v2034_v44  ;;  %v3004_v46 = vpop.f32.mrb[23].mxu0  ;;  %v2467_v44 = vlaneseq }
0x2b65   :  { %2046 = vrot.lane.b32.xlu0 %v2035_v45, %s3606_s12  ;;  %v2038_v4 = vadd.f32 %v2035_v45, %v1330_v32 }
0x2b67   :  { %v2659_v51 = vmul.f32 -1.442695, %v2038_v4 }
0x2b69   :  { %3283 = vpow2.f32 %v2659_v51 }
0x2b6a   :  { %v3026_v35 = vpop.f32.mrb[24].mxu0 }
0x2b6b   :  { %v2253_v30 = vpop.f32.mrb[25].mxu0  ;;  %v2259_v15 = vadd.f32 %v3026_v35, %v4190_v12  ;;  %v2466_v35 = vunpack.c.0.s8 %v2465_v43 }
0x2b6c   :  { %v2254_v13 = vadd.f32 %v4190_v12, %v2253_v30  ;;  %v4217_v30 = vshrl.u32 %v2467_v44, 7 }
0x2b6d   :  { %v2301_v14 = vmul.f32 0.2, %v2259_v15  ;;  %vm2293_vm5 = vcmp.gt.f32.partialorder %v2259_v15, 0.0 }
0x2b6e   :  { %v3029_v48 = vpop.f32.mrb[26].mxu0  ;;  %v2300_v39 = vmul.f32 0.2, %v2254_v13  ;;  %vm2292_vm4 = vcmp.gt.f32.partialorder %v2254_v13, 0.0 }
0x2b6f   :  { %v2263_v11 = vpop.f32.mrb[27].mxu0  ;;  %v2269_v17 = vadd.f32 %v3029_v48, %v4190_v12  ;;  %v2309_v22 = vsel %vm2293_vm5, %v2259_v15, %v2301_v14 }
0x2b70   :  { %v2264_v16 = vadd.f32 %v4190_v12, %v2263_v11  ;;  %v2308_v21 = vsel %vm2292_vm4, %v2254_v13, %v2300_v39 }
0x2b71   :  { %v2303_v23 = vmul.f32 0.2, %v2269_v17  ;;  %vm2295_vm7 = vcmp.gt.f32.partialorder %v2269_v17, 0.0 }
0x2b72   :  { %v3032_v49 = vpop.f32.mrb[28].mxu0  ;;  %v2302_v19 = vmul.f32 0.2, %v2264_v16  ;;  %vm2294_vm6 = vcmp.gt.f32.partialorder %v2264_v16, 0.0 }
0x2b73   :  { %v2273_v50 = vpop.f32.mrb[29].mxu0  ;;  %v3284_v52 = vpop.eup %3283  ;;  %v2279_v56 = vadd.f32 %v3032_v49, %v4190_v12  ;;  %v2311_v0 = vsel %vm2295_vm7, %v2269_v17, %v2303_v23  ;;  %v4220_v49 = vsub.s32 %v2466_v35, %v4217_v30 }
0x2b74   :  { %v2042_v53 = vadd.f32 1.0, %v3284_v52  ;;  %v2274_v20 = vadd.f32 %v4190_v12, %v2273_v50  ;;  %v2310_v1 = vsel %vm2294_vm6, %v2264_v16, %v2302_v19 }
0x2b75   :  { %v2305_v27 = vmul.f32 0.2, %v2279_v56  ;;  %vm2297_vm9 = vcmp.gt.f32.partialorder %v2279_v56, 0.0 }
0x2b76   :  { %3285 = vrcp.f32 %v2042_v53  ;;  %v2304_v25 = vmul.f32 0.2, %v2274_v20  ;;  %vm2296_vm8 = vcmp.gt.f32.partialorder %v2274_v20, 0.0 }
0x2b77   :  { %v2313_v28 = vsel %vm2297_vm9, %v2279_v56, %v2305_v27 }
0x2b78   :  { %v2312_v59 = vsel %vm2296_vm8, %v2274_v20, %v2304_v25 }
0x2b80   :  { %v3286_v54 = vpop.eup %3285 }
0x2bd7   :  { %v2047_v55 = vpop.permute.xlu0 %2046 }
0x2bd8   :  { %v2049_v57 = vmul.f32 %v3286_v54, %v2047_v55 }
0x2bda   :  { %2051 = vrot.lane.b32.xlu1 %v2049_v57, %s3606_s12 }
0x2c4c   :  { %v2052_v58 = vpop.permute.xlu1 %2051 }
0x2c4d   :  { %v2054_v60 = vadd.f32 %v2052_v58, %v1330_v32 }
0x2c4f   :  { %3287 = vtanh.f32 %v2054_v60 }
0x2c59   :  { %v3288_v61 = vpop.eup %3287 }
0x2c5a   :  { %v2056_v36 = vsub.f32 %v1962_v37, %v3288_v61 }
0x2c5c   :  { %2058 = vrot.lane.b32.xlu0 %v2056_v36, %s3607_s6 }
0x2cce   :  { %v2059_v62 = vpop.permute.xlu0 %2058 }
0x2ccf   :  { %v2061_v6 = vmul.f32 %v3286_v54, %v2059_v62 }
0x2cd1   :  { %2063 = vrot.lane.b32.xlu1 %v2061_v6, %s3608_s27  ;;  %v1335_v6 = vadd.f32 %v4078_v5, %v4042_v8 }
0x2d43   :  { %v2064_v9 = vpop.permute.xlu1 %2063 }
0x2d44   :  { %v4186_v10 = vadd.f32 %v3288_v61, %v2064_v9 }
0x2d46   :  { %2068 = vrot.lane.b32.xlu0 %v4186_v10, %s3606_s12 }
0x2db8   :  { %v2069_v18 = vpop.permute.xlu0 %2068 }
0x2db9   :  { %3014 = vmatmul.mubr.msk.f32.vlgmr.msra.gmra.mrb[18].mxu1 %vm307_vm3, %v2069_v18  ;;  %3033 = vmatprep.mubr.msk.f32.mxu0 %vm307_vm3, %v2069_v18 }
0x2dba   :  { %3176 = vmatpush3.bf16.msra.mxu1 %v3173_v7  ;;  %3040 = vmatprep.mubr.msk.f32.mxu1 %vm219_vm1, %v2308_v21 }
0x2dbd   :  { %3041 = vmatmul.mubr.msk.f32.vlgmr.msra.gmra.mrb[20].mxu1 %vm219_vm1, %v2309_v22 }
0x2dbe   :  { %3043 = vmatprep.mubr.msk.f32.mxu1 %vm219_vm1, %v2310_v1 }
0x2dc1   :  { %3044 = vmatmul.mubr.msk.f32.gmra.mrb[22].mxu1 %vm219_vm1, %v2311_v0 }
0x2dc2   :  { %3046 = vmatprep.mubr.msk.f32.mxu1 %vm219_vm1, %v2312_v59 }
0x2dc5   :  { %3047 = vmatmul.mubr.msk.f32.gmra.mrb[24].mxu1 %vm219_vm1, %v2313_v28 }
0x2e8c   :  { %v2138_v38 = vpop.f32.mrb[18].mxu1 }
0x2e8d   :  { %v2139_v29 = vadd.f32 %v4038_v3, %v2138_v38  ;;  %v3015_v26 = vpop.f32.mrb[19].mxu1 }
0x2e8f   :  { %2150 = vrot.lane.b32.xlu1 %v2139_v29, %s3606_s12  ;;  %v2142_v63 = vadd.f32 %v2139_v29, %v1335_v6 }
0x2e90   :  { %v3042_v33 = vpop.f32.mrb[20].mxu1 }
0x2e91   :  { %v2421_v34 = vadd.f32 %v3042_v33, %v4210_v31  ;;  %v2415_v47 = vpop.f32.mrb[21].mxu1  ;;  %v2661_v2 = vmul.f32 -1.442695, %v2142_v63  ;;  %v3610_v33 = vmov 1934713408  }
0x2e92   :  { %v2416_v24 = vadd.f32 %v4210_v31, %v2415_v47 }
0x2e93   :  { %3289 = vtanh.f32 %v2421_v34  ;;  %v2529_v34 = vunpack.c.l.s4 %v3610_v33 }
0x2e94   :  { %v3045_v37 = vpop.f32.mrb[22].mxu1  ;;  %3291 = vtanh.f32 %v2416_v24 }
0x2e95   :  { %v2431_v40 = vadd.f32 %v3045_v37, %v4210_v31  ;;  %v2425_v41 = vpop.f32.mrb[23].mxu1  ;;  %v2530_v37 = vunpack.c.0.s8 %v2529_v34 }
0x2e96   :  { %v2426_v3 = vadd.f32 %v4210_v31, %v2425_v41 }
0x2e97   :  { %3293 = vtanh.f32 %v2431_v40 }
0x2e98   :  { %3295 = vtanh.f32 %v2426_v3  ;;  %v3048_v45 = vpop.f32.mrb[24].mxu1 }
0x2e99   :  { %v2435_v46 = vpop.f32.mrb[25].mxu1  ;;  %3297 = vpow2.f32 %v2661_v2  ;;  %v2441_v59 = vadd.f32 %v3048_v45, %v4210_v31  ;;  %v2533_v45 = vsub.s32 %v2530_v37, %v4217_v30 }
0x2e9a   :  { %v2436_v28 = vadd.f32 %v4210_v31, %v2435_v46 }
0x2e9d   :  { %v3290_v48 = vpop.eup %3289 }
0x2e9e   :  { %v3292_v11 = vpop.eup %3291 }
0x2ea1   :  { %v3294_v50 = vpop.eup %3293 }
0x2ea2   :  { %v3296_v32 = vpop.eup %3295  ;;  %v2478_v4 = vcombine.low %v3290_v48, %v3294_v50  ;;  %v2479_v51 = vcombine.high %v3290_v48, %v3294_v50 }
0x2ea3   :  { %v2462_v52 = vcombine.low %v3292_v11, %v3296_v32  ;;  %v2463_v53 = vcombine.high %v3292_v11, %v3296_v32  ;;  %v3298_v7 = vpop.eup %3297 }
0x2ea4   :  { %v4223_v54 = vrot.slane %v2478_v4, %v4220_v49  ;;  %v4226_v55 = vrot.slane %v2479_v51, %v4220_v49  ;;  %v2146_v9 = vadd.f32 1.0, %v3298_v7 }
0x2ea5   :  { %v4229_v57 = vrot.slane %v2462_v52, %v4220_v49  ;;  %v4232_v58 = vrot.slane %v2463_v53, %v4220_v49 }
0x2ea6   :  { %3299 = vrcp.f32 %v2146_v9 }
0x2ea7   :  { %v2526_v60 = vcombine.low %v4229_v57, %v4223_v54  ;;  %v2527_v61 = vcombine.high %v4229_v57, %v4223_v54  ;;  %v2542_v36 = vcombine.low %v4232_v58, %v4226_v55  ;;  %v2543_v62 = vcombine.high %v4232_v58, %v4226_v55 }
0x2ea9   :  { %v2534_v51 = vrot.slane %v2526_v60, %v2533_v45  ;;  %v2541_v30 = vrot.slane %v2527_v61, %v2533_v45  ;;  %v2557_v2 = vrot.slane %v2543_v62, %v2533_v45 }
0x2eb0   :  { %v3300_v13 = vpop.eup %3299 }
0x2f01   :  { %v2151_v15 = vpop.permute.xlu1 %2150 }
0x2f02   :  { %v2153_v39 = vmul.f32 %v3300_v13, %v2151_v15 }
0x2f04   :  { %2155 = vrot.lane.b32.xlu0 %v2153_v39, %s3606_s12 }
0x2f76   :  { %v2156_v16 = vpop.permute.xlu0 %2155 }
0x2f77   :  { %v2158_v14 = vadd.f32 %v2156_v16, %v1335_v6 }
0x2f79   :  { %3301 = vtanh.f32 %v2158_v14 }
0x2f7a   :  { %3303 = vtanh.f32 %v2441_v59 }
0x2f7b   :  { %3305 = vtanh.f32 %v2436_v28 }
0x2f83   :  { %v3302_v17 = vpop.eup %3301 }
0x2f84   :  { %v2160_v18 = vsub.f32 %v4186_v10, %v3302_v17  ;;  %v3304_v47 = vpop.eup %3303 }
0x2f85   :  { %v3306_v24 = vpop.eup %3305 }
0x2f86   :  { %2162 = vrot.lane.b32.xlu1 %v2160_v18, %s3607_s6 }
0x2ff8   :  { %v2163_v8 = vpop.permute.xlu1 %2162 }
0x2ff9   :  { %v2165_v5 = vmul.f32 %v3300_v13, %v2163_v8 }
0x2ffb   :  { %2167 = vrot.lane.b32.xlu0 %v2165_v5, %s3608_s27 }
0x306d   :  { %v2168_v19 = vpop.permute.xlu0 %2167 }
0x306e   :  { %v2170_v20 = vadd.f32 %v3302_v17, %v2168_v19 }
0x3070   :  { %2183 = vrot.lane.b32.xlu1 %v2170_v20, %s3606_s12 }
0x30e2   :  { %v2184_v21 = vpop.permute.xlu1 %2183 }
0x30e3   :  { %3034 = vmatmul.mubr.msk.f32.gmra.mrb[30].mxu0 %vm307_vm3, %v2184_v21 }
0x31b6   :  { %v3035_v22 = vpop.f32.mrb[30].mxu0 }
0x31b7   :  { %v2289_v23 = vadd.f32 %v3035_v22, %v4190_v12  ;;  %v2283_v56 = vpop.f32.mrb[31].mxu0 }
0x31b8   :  { %v2284_v25 = vadd.f32 %v4190_v12, %v2283_v56 }
0x31b9   :  { %v2307_v10 = vmul.f32 0.2, %v2289_v23  ;;  %vm2299_vm10 = vcmp.gt.f32.partialorder %v2289_v23, 0.0 }
0x31ba   :  { %vm2298_vm11 = vcmp.gt.f32.partialorder %v2284_v25, 0.0  ;;  %v2306_v1 = vmul.f32 0.2, %v2284_v25 }
0x31bb   :  { %v2315_v0 = vsel %vm2299_vm10, %v2289_v23, %v2307_v10 }
0x31bc   :  { %v2314_v27 = vsel %vm2298_vm11, %v2284_v25, %v2306_v1 }
0x31bd   :  { %3049 = vmatprep.mubr.msk.f32.mxu1 %vm219_vm1, %v2314_v27 }
0x31be   :  { %3050 = vmatmul.mubr.msk.f32.gmra.mrb[26].mxu1 %vm219_vm1, %v2315_v0 }
0x3291   :  { %v3051_v38 = vpop.f32.mrb[26].mxu1 }
0x3292   :  { %v2451_v29 = vadd.f32 %v3051_v38, %v4210_v31  ;;  %v2445_v26 = vpop.f32.mrb[27].mxu1 }
0x3293   :  { %v2446_v12 = vadd.f32 %v4210_v31, %v2445_v26 }
0x3294   :  { %3307 = vtanh.f32 %v2451_v29 }
0x3295   :  { %3309 = vtanh.f32 %v2446_v12 }
0x329e   :  { %v3308_v40 = vpop.eup %3307 }
0x329f   :  { %v3310_v41 = vpop.eup %3309  ;;  %v2510_v3 = vcombine.low %v3304_v47, %v3308_v40  ;;  %v2511_v42 = vcombine.high %v3304_v47, %v3308_v40 }
0x32a0   :  { %v2494_v43 = vcombine.low %v3306_v24, %v3310_v41  ;;  %v2495_v44 = vcombine.high %v3306_v24, %v3310_v41 }
0x32a1   :  { %v2518_v46 = vrot.slane %v2510_v3, %v4220_v49  ;;  %v2525_v35 = vrot.slane %v2511_v42, %v4220_v49 }
0x32a2   :  { %v2502_v31 = vrot.slane %v2494_v43, %v4220_v49  ;;  %v2509_v48 = vrot.slane %v2495_v44, %v4220_v49  ;;  %v2550_v49 = vrot.slane %v2542_v36, %v2533_v45 }
0x32a4   :  { %v2558_v11 = vcombine.low %v2502_v31, %v2518_v46  ;;  %v2559_v50 = vcombine.high %v2502_v31, %v2518_v46  ;;  %v2574_v32 = vcombine.low %v2509_v48, %v2525_v35  ;;  %v2575_v4 = vcombine.high %v2509_v48, %v2525_v35 }
0x32a6   :  { %v2566_v52 = vrot.slane %v2558_v11, %v2533_v45  ;;  %v2573_v53 = vrot.slane %v2559_v50, %v2533_v45  ;;  %v2582_v6 = vrot.slane %v2574_v32, %v2533_v45  ;;  %v2589_v63 = vrot.slane %v2575_v4, %v2533_v45 }
0x32a8   :  { %v2590_v7 = vcombine.low %v2534_v51, %v2566_v52  ;;  %v2591_v9 = vcombine.high %v2534_v51, %v2566_v52  ;;  %v2592_v13 = vcombine.low %v2541_v30, %v2573_v53  ;;  %v2593_v60 = vcombine.high %v2541_v30, %v2573_v53 }
0x32a9   :  { %v2594_v15 = vcombine.low %v2550_v49, %v2582_v6  ;;  %v2595_v39 = vcombine.high %v2550_v49, %v2582_v6  ;;  %v2596_v54 = vcombine.low %v2557_v2, %v2589_v63  ;;  %v2597_v57 = vcombine.high %v2557_v2, %v2589_v63 }
0x32aa   :  { %2598 = vst [vmem:[%s4317_s19] sm:$0xff] %v2590_v7  ;;  %2599 = vst [vmem:[%s4317_s19 + $0x8] sm:$0xff] %v2591_v9 }
0x32ab   :  { %2600 = vst [vmem:[%s4317_s19 + $0x10] sm:$0xff] %v2592_v13  ;;  %2601 = vst [vmem:[%s4317_s19 + $0x18] sm:$0xff] %v2593_v60 }
0x32ac   :  { %2602 = vst [vmem:[%s4317_s19 + $0x20] sm:$0xff] %v2594_v15  ;;  %2603 = vst [vmem:[%s4317_s19 + $0x28] sm:$0xff] %v2595_v39 }
0x32ad   :  { %2604 = vst [vmem:[%s4317_s19 + $0x30] sm:$0xff] %v2596_v54  ;;  %2605 = vst [vmem:[%s4317_s19 + $0x38] sm:$0xff] %v2597_v57 }
0x32ae   :  { %2610 = vsyncpa [#allocation3], 1 }
0x32af   :  { %2611 = vsyncpa [#allocation5], 1 }
0x32b0   :  { %2612 = vsyncpa [#allocation8], 1 }
0x32b1   :  { %2613 = vsyncpa [#allocation11], 1 }
0x32b2   :  { %2614 = vsyncpa [#allocation14], 1 }
0x32b3   :  { %2615 = vsyncpa [#allocation17], 1 }
0x32b4   :  { %2616 = vsyncpa [#allocation20], 1 }

</bundles_post_ra>
